<compile_context>
chip_gen: v6e
topology: v6e:2x2x1
jax: 0.10.0
libtpu: 0.0.40
codegen_flags: <defaults>
</compile_context>

<pallas_src>
import jax
import jax.numpy as jnp
import numpy as np
from jax import lax
from jax.experimental import pallas as pl
from jax.experimental.pallas import tpu as pltpu


# ----------------------------------------------------------------------------
# Fused Pallas kernel: embedding gather + L-layer LSTM wavefront + flatten + FC + sigmoid
# ----------------------------------------------------------------------------
def _make_fused_kernel(T, B, E, H, L, O):
    def kernel(*refs):
        n_in = 6 + 3 * L
        seq_ref = refs[0]                    # (B*T,) int32 in SMEM, batch-major [b, t]
        emb_ref = refs[1]                    # (Vpad, E) f32 in VMEM
        h0_ref = refs[2]                     # (L*B, H)
        c0_ref = refs[3]                     # (L*B, H)
        layer_refs = refs[4:4 + 3 * L]       # per layer: W_ih^T (D,4H), W_hh^T (H,4H), bias (1,4H)
        fcw_ref = refs[4 + 3 * L]            # (T*H, O)
        fcb_ref = refs[5 + 3 * L]            # (1, O)
        out_ref = refs[n_in + 0]             # (B, O)
        hN_ref = refs[n_in + 1]              # (L*B, H)
        cN_ref = refs[n_in + 2]              # (L*B, H)
        x_s = refs[n_in + 3]                 # (T*B, E)   time-major embedded input
        gx_s = refs[n_in + 4]                # (T*B, 4H)  hoisted layer-0 gate pre-activations
        yb_s = refs[n_in + 5]                # (B, T*H)   lane-dense flattened last-layer output

        # --- Fused embedding gather + time-major layout (replaces XLA take/transpose) ---
        for t in range(T):
            for b in range(B):
                tok = seq_ref[b * T + t]                               # SMEM scalar
                x_s[pl.ds(t * B + b, 1), :] = emb_ref[pl.ds(tok, 1), :]

        # --- Hoisted layer-0 input projection: one batched MXU matmul, staged in VMEM ---
        gx_s[...] = (jnp.dot(x_s[...], layer_refs[0][...],
                             preferred_element_type=jnp.float32)
                     + layer_refs[2][...])

        # Gate-scale constant (x2 on the g quadrant), hoisted out of the recurrence.
        lane = lax.broadcasted_iota(jnp.int32, (1, 4 * H), 1)
        g_scale = jnp.where((lane >= 2 * H) & (lane < 3 * H), 2.0, 1.0).astype(jnp.float32)

        h = [h0_ref[l * B:(l + 1) * B, :] for l in range(L)]
        c = [c0_ref[l * B:(l + 1) * B, :] for l in range(L)]
        y_prev = [None] * L   # y_prev[l]: layer-l output produced on the previous wavefront step

        # --- Layer wavefront: stage s runs layer l at time t = s - l (T+L-1 stages) ---
        for s in range(T + L - 1):
            y_curr = list(y_prev)
            for l in range(L):
                t = s - l
                if t < 0 or t >= T:
                    continue
                whh_ref = layer_refs[3 * l + 1]
                if l == 0:
                    pre = gx_s[pl.ds(t * B, B), :]                     # bias already folded in
                else:
                    pre = (jnp.dot(y_prev[l - 1], layer_refs[3 * l + 0][...],
                                   preferred_element_type=jnp.float32)
                           + layer_refs[3 * l + 2][...])
                gates = pre + jnp.dot(h[l], whh_ref[...],
                                      preferred_element_type=jnp.float32)
                sg = jax.nn.sigmoid(gates * g_scale)                   # one EUP pass over (B,4H)
                i_g = sg[:, 0 * H:1 * H]
                f_g = sg[:, 1 * H:2 * H]
                g_g = 2.0 * sg[:, 2 * H:3 * H] - 1.0                   # tanh(g) = 2*sigmoid(2g)-1
                o_g = sg[:, 3 * H:4 * H]
                c_new = f_g * c[l] + i_g * g_g
                h_new = o_g * jnp.tanh(c_new)
                c[l] = c_new
                h[l] = h_new
                y_curr[l] = h_new
                if l == L - 1:
                    # PyTorch batch_first flatten: out.view(B, T*H), time-fastest per row.
                    yb_s[:, t * H:(t + 1) * H] = h_new
            y_prev = y_curr

        # Final hidden / cell states: written exactly once per layer.
        for l in range(L):
            hN_ref[l * B:(l + 1) * B, :] = h[l]
            cN_ref[l * B:(l + 1) * B, :] = c[l]

        # Flatten (free: yb_s already is (B, T*H)) -> FC -> sigmoid.
        logits = (jnp.dot(yb_s[...], fcw_ref[...],
                          preferred_element_type=jnp.float32) + fcb_ref[...])
        out_ref[...] = jax.nn.sigmoid(logits)

    return kernel


def recurrent_net_pallas(seq_flat, emb, h0_2d, c0_2d, wih_t, whh_t, bias,
                         fc_w_t, fc_b, *, num_layers, batch, seq_len):
    """seq_flat: (B*T,) int32 batch-major; h0_2d/c0_2d: (L*B, H)."""
    L, B, T = num_layers, batch, seq_len
    E = emb.shape[-1]
    H = h0_2d.shape[-1]
    O = fc_w_t.shape[-1]

    kernel = _make_fused_kernel(T, B, E, H, L, O)

    args = [seq_flat, emb, h0_2d, c0_2d]
    for l in range(L):
        args += [wih_t[l], whh_t[l], bias[l]]
    args += [fc_w_t, fc_b]

    in_specs = ([pl.BlockSpec(memory_space=pltpu.MemorySpace.SMEM)]            # token ids
                + [pl.BlockSpec(memory_space=pltpu.MemorySpace.VMEM)] * (len(args) - 1))
    out_specs = (pl.BlockSpec(memory_space=pltpu.MemorySpace.VMEM),
                 pl.BlockSpec(memory_space=pltpu.MemorySpace.VMEM),
                 pl.BlockSpec(memory_space=pltpu.MemorySpace.VMEM))
    out_shapes = (jax.ShapeDtypeStruct((B, O), jnp.float32),
                  jax.ShapeDtypeStruct((L * B, H), jnp.float32),
                  jax.ShapeDtypeStruct((L * B, H), jnp.float32))

    return pl.pallas_call(
        kernel,
        out_shape=out_shapes,
        in_specs=in_specs,
        out_specs=out_specs,
        scratch_shapes=[pltpu.VMEM((T * B, E), jnp.float32),       # gathered embeddings
                        pltpu.VMEM((T * B, 4 * H), jnp.float32),   # hoisted layer-0 projection
                        pltpu.VMEM((B, T * H), jnp.float32)],      # lane-dense flattened output
        # Explicit VMEM budget (review v7x note: re-derive vs 64 MiB if sizes grow);
        # today's footprint is ~100 KB, this is pure headroom on every generation.
        compiler_params=pltpu.CompilerParams(vmem_limit_bytes=32 * 1024 * 1024),
    )(*args)


# ----------------------------------------------------------------------------
# Model wrapper (only free reshapes remain outside the kernel)
# ----------------------------------------------------------------------------
def recurrent_net_forward(params, sequence, hidden):
    """sequence: (B, T) int32; hidden: (h0, c0) each (num_layers, B, H)."""
    h0_all, c0_all = hidden
    L, B_h, H = h0_all.shape
    B, T = sequence.shape

    seq_flat = sequence.reshape(-1).astype(jnp.int32)              # (B*T,) batch-major

    out, hN_2d, cN_2d = recurrent_net_pallas(
        seq_flat, params["emb"],
        h0_all.reshape(L * B_h, H), c0_all.reshape(L * B_h, H),
        params["wih_t"], params["whh_t"], params["bias"],
        params["fc_w_t"], params["fc_b"],
        num_layers=L, batch=B, seq_len=T)

    # TODO(synk): inter-layer LSTM dropout is training-only; inference no-op here.
    return out, (hN_2d.reshape(L, B_h, H), cN_2d.reshape(L, B_h, H))


# ----------------------------------------------------------------------------
# Pure-JAX reference (numerical validation)
# ----------------------------------------------------------------------------
def reference_forward(params, sequence, hidden):
    h0_all, c0_all = hidden
    num_layers = h0_all.shape[0]
    H = h0_all.shape[-1]
    emb = jnp.take(params["emb"], sequence, axis=0)                 # (B, T, E)
    x = jnp.transpose(emb, (1, 0, 2)).astype(jnp.float32)           # (T, B, E)

    hp = jax.lax.Precision.HIGHEST
    h_finals, c_finals = [], []
    for l in range(num_layers):
        wih_t, whh_t, b = params["wih_t"][l], params["whh_t"][l], params["bias"][l]

        def step(carry, x_t):
            h, c = carry
            gates = (jnp.dot(x_t, wih_t, precision=hp)
                     + jnp.dot(h, whh_t, precision=hp) + b)
            i_g = jax.nn.sigmoid(gates[:, 0 * H:1 * H])
            f_g = jax.nn.sigmoid(gates[:, 1 * H:2 * H])
            g_g = jnp.tanh(gates[:, 2 * H:3 * H])
            o_g = jax.nn.sigmoid(gates[:, 3 * H:4 * H])
            c_new = f_g * c + i_g * g_g
            h_new = o_g * jnp.tanh(c_new)
            return (h_new, c_new), h_new

        (hN, cN), y = lax.scan(step, (h0_all[l], c0_all[l]), x)
        x = y
        h_finals.append(hN)
        c_finals.append(cN)

    out_bth = jnp.transpose(x, (1, 0, 2))
    flat = out_bth.reshape(out_bth.shape[0], -1)
    logits = jax.nn.sigmoid(
        jnp.dot(flat, params["fc_w_t"], precision=hp) + params["fc_b"])
    return logits, (jnp.stack(h_finals), jnp.stack(c_finals))


# ----------------------------------------------------------------------------
# Deterministic parameter construction (PyTorch-style layouts, pre-transposed)
# ----------------------------------------------------------------------------
def init_params(key, *, seq_len, vocab_size, embedding_size, num_layers,
                hidden_size, output_size):
    keys = jax.random.split(key, 3 + 4 * num_layers)
    k_emb, k_fc_w, k_fc_b = keys[0], keys[1], keys[2]
    lstm_keys = keys[3:]

    emb = jax.random.normal(k_emb, (vocab_size, embedding_size), jnp.float32)
    # Pad vocab rows to a multiple of 8 sublanes (pure layout hygiene for the in-kernel
    # dynamic row gather; indices never touch the padding, so the reference is unaffected).
    pad_rows = (-vocab_size) % 8
    if pad_rows:
        emb = jnp.concatenate(
            [emb, jnp.zeros((pad_rows, embedding_size), jnp.float32)], axis=0)

    bound = 1.0 / np.sqrt(hidden_size)
    wih_t, whh_t, bias = [], [], []
    for l in range(num_layers):
        in_dim = embedding_size if l == 0 else hidden_size
        k0, k1, k2, k3 = lstm_keys[4 * l: 4 * l + 4]
        w_ih = jax.random.uniform(k0, (4 * hidden_size, in_dim),
                                  jnp.float32, -bound, bound)
        w_hh = jax.random.uniform(k1, (4 * hidden_size, hidden_size),
                                  jnp.float32, -bound, bound)
        b_ih = jax.random.uniform(k2, (4 * hidden_size,), jnp.float32, -bound, bound)
        b_hh = jax.random.uniform(k3, (4 * hidden_size,), jnp.float32, -bound, bound)
        wih_t.append(w_ih.T)                                 # (in_dim, 4H)
        whh_t.append(w_hh.T)                                 # (H, 4H)
        bias.append((b_ih + b_hh)[None, :])                  # (1, 4H)

    fc_in = hidden_size * seq_len
    fc_bound = 1.0 / np.sqrt(fc_in)
    fc_w = jax.random.uniform(k_fc_w, (output_size, fc_in),
                              jnp.float32, -fc_bound, fc_bound)
    fc_b = jax.random.uniform(k_fc_b, (output_size,),
                              jnp.float32, -fc_bound, fc_bound)

    return dict(emb=emb, wih_t=wih_t, whh_t=whh_t, bias=bias,
                fc_w_t=fc_w.T, fc_b=fc_b[None, :])


# ----------------------------------------------------------------------------
if __name__ == "__main__":
    batch = 2
    seq_len = 8
    vocab_size = 50
    embedding_size = 16
    num_layers = 2
    hidden_size = 32
    output_size = 4

    key = jax.random.PRNGKey(0)
    k_params, k_seq = jax.random.split(key)

    params = init_params(
        k_params, seq_len=seq_len, vocab_size=vocab_size,
        embedding_size=embedding_size, num_layers=num_layers,
        hidden_size=hidden_size, output_size=output_size)

    sequence = jax.random.randint(k_seq, (batch, seq_len), 0, vocab_size,
                                  dtype=jnp.int32)
    # Standard LSTM hidden shape (num_layers, batch, hidden), zero-initialized.
    hidden = (jnp.zeros((num_layers, batch, hidden_size), jnp.float32),
              jnp.zeros((num_layers, batch, hidden_size), jnp.float32))

    fwd = jax.jit(recurrent_net_forward)
    out, (hN, cN) = fwd(params, sequence, hidden)
    jax.block_until_ready((out, hN, cN))

    ref_out, (ref_hN, ref_cN) = reference_forward(params, sequence, hidden)
    np.testing.assert_allclose(np.asarray(out), np.asarray(ref_out),
                               rtol=1e-3, atol=1e-3)
    np.testing.assert_allclose(np.asarray(hN), np.asarray(ref_hN),
                               rtol=1e-3, atol=1e-3)
    np.testing.assert_allclose(np.asarray(cN), np.asarray(ref_cN),
                               rtol=1e-3, atol=1e-3)

    assert out.shape == (batch, output_size)
    assert hN.shape == (num_layers, batch, hidden_size)
    assert cN.shape == (num_layers, batch, hidden_size)

    print("KERNEL_OK")
</pallas_src>

<mosaic_0001>
module attributes {stable_mosaic.version = 11 : i64} {
  func.func @kernel(%arg0: memref<16xi32, #tpu.memory_space<smem>>, %arg1: memref<56x16xf32, #tpu.memory_space<vmem>>, %arg2: memref<4x32xf32, #tpu.memory_space<vmem>>, %arg3: memref<4x32xf32, #tpu.memory_space<vmem>>, %arg4: memref<16x128xf32, #tpu.memory_space<vmem>>, %arg5: memref<32x128xf32, #tpu.memory_space<vmem>>, %arg6: memref<1x128xf32, #tpu.memory_space<vmem>>, %arg7: memref<32x128xf32, #tpu.memory_space<vmem>>, %arg8: memref<32x128xf32, #tpu.memory_space<vmem>>, %arg9: memref<1x128xf32, #tpu.memory_space<vmem>>, %arg10: memref<256x4xf32, #tpu.memory_space<vmem>>, %arg11: memref<1x4xf32, #tpu.memory_space<vmem>>, %arg12: memref<2x4xf32, #tpu.memory_space<vmem>>, %arg13: memref<4x32xf32, #tpu.memory_space<vmem>>, %arg14: memref<4x32xf32, #tpu.memory_space<vmem>>, %arg15: memref<16x16xf32, #tpu.memory_space<vmem>>, %arg16: memref<16x128xf32, #tpu.memory_space<vmem>>, %arg17: memref<2x256xf32, #tpu.memory_space<vmem>>) attributes {dimension_semantics = [], scalar_prefetch = 0 : i64, scratch_operands = 3 : i64, tpu.core_type = #tpu.core_type<tc>} {
    %c0 = arith.constant 0 : index
    %0 = memref.load %arg0[%c0] : memref<16xi32, #tpu.memory_space<smem>>
    %1 = arith.index_cast %0 : i32 to index
    %c0_0 = arith.constant 0 : index
    %2 = vector.load %arg1[%1, %c0_0] : memref<56x16xf32, #tpu.memory_space<vmem>>, vector<1x16xf32>
    %c0_1 = arith.constant 0 : index
    %c0_2 = arith.constant 0 : index
    %3 = vector.load %arg15[%c0_1, %c0_2] : memref<16x16xf32, #tpu.memory_space<vmem>>, vector<1x16xf32>
    tpu.vector_store %arg15[%c0_1, %c0_2], %2 {strides = array<i32>} : memref<16x16xf32, #tpu.memory_space<vmem>>, vector<1x16xf32>,
    %c8 = arith.constant 8 : index
    %4 = memref.load %arg0[%c8] : memref<16xi32, #tpu.memory_space<smem>>
    %5 = arith.index_cast %4 : i32 to index
    %c0_3 = arith.constant 0 : index
    %6 = vector.load %arg1[%5, %c0_3] : memref<56x16xf32, #tpu.memory_space<vmem>>, vector<1x16xf32>
    %c1 = arith.constant 1 : index
    %c0_4 = arith.constant 0 : index
    %7 = vector.load %arg15[%c1, %c0_4] : memref<16x16xf32, #tpu.memory_space<vmem>>, vector<1x16xf32>
    tpu.vector_store %arg15[%c1, %c0_4], %6 {strides = array<i32>} : memref<16x16xf32, #tpu.memory_space<vmem>>, vector<1x16xf32>,
    %c1_5 = arith.constant 1 : index
    %8 = memref.load %arg0[%c1_5] : memref<16xi32, #tpu.memory_space<smem>>
    %9 = arith.index_cast %8 : i32 to index
    %c0_6 = arith.constant 0 : index
    %10 = vector.load %arg1[%9, %c0_6] : memref<56x16xf32, #tpu.memory_space<vmem>>, vector<1x16xf32>
    %c2 = arith.constant 2 : index
    %c0_7 = arith.constant 0 : index
    %11 = vector.load %arg15[%c2, %c0_7] : memref<16x16xf32, #tpu.memory_space<vmem>>, vector<1x16xf32>
    tpu.vector_store %arg15[%c2, %c0_7], %10 {strides = array<i32>} : memref<16x16xf32, #tpu.memory_space<vmem>>, vector<1x16xf32>,
    %c9 = arith.constant 9 : index
    %12 = memref.load %arg0[%c9] : memref<16xi32, #tpu.memory_space<smem>>
    %13 = arith.index_cast %12 : i32 to index
    %c0_8 = arith.constant 0 : index
    %14 = vector.load %arg1[%13, %c0_8] : memref<56x16xf32, #tpu.memory_space<vmem>>, vector<1x16xf32>
    %c3 = arith.constant 3 : index
    %c0_9 = arith.constant 0 : index
    %15 = vector.load %arg15[%c3, %c0_9] : memref<16x16xf32, #tpu.memory_space<vmem>>, vector<1x16xf32>
    tpu.vector_store %arg15[%c3, %c0_9], %14 {strides = array<i32>} : memref<16x16xf32, #tpu.memory_space<vmem>>, vector<1x16xf32>,
    %c2_10 = arith.constant 2 : index
    %16 = memref.load %arg0[%c2_10] : memref<16xi32, #tpu.memory_space<smem>>
    %17 = arith.index_cast %16 : i32 to index
    %c0_11 = arith.constant 0 : index
    %18 = vector.load %arg1[%17, %c0_11] : memref<56x16xf32, #tpu.memory_space<vmem>>, vector<1x16xf32>
    %c4 = arith.constant 4 : index
    %c0_12 = arith.constant 0 : index
    %19 = vector.load %arg15[%c4, %c0_12] : memref<16x16xf32, #tpu.memory_space<vmem>>, vector<1x16xf32>
    tpu.vector_store %arg15[%c4, %c0_12], %18 {strides = array<i32>} : memref<16x16xf32, #tpu.memory_space<vmem>>, vector<1x16xf32>,
    %c10 = arith.constant 10 : index
    %20 = memref.load %arg0[%c10] : memref<16xi32, #tpu.memory_space<smem>>
    %21 = arith.index_cast %20 : i32 to index
    %c0_13 = arith.constant 0 : index
    %22 = vector.load %arg1[%21, %c0_13] : memref<56x16xf32, #tpu.memory_space<vmem>>, vector<1x16xf32>
    %c5 = arith.constant 5 : index
    %c0_14 = arith.constant 0 : index
    %23 = vector.load %arg15[%c5, %c0_14] : memref<16x16xf32, #tpu.memory_space<vmem>>, vector<1x16xf32>
    tpu.vector_store %arg15[%c5, %c0_14], %22 {strides = array<i32>} : memref<16x16xf32, #tpu.memory_space<vmem>>, vector<1x16xf32>,
    %c3_15 = arith.constant 3 : index
    %24 = memref.load %arg0[%c3_15] : memref<16xi32, #tpu.memory_space<smem>>
    %25 = arith.index_cast %24 : i32 to index
    %c0_16 = arith.constant 0 : index
    %26 = vector.load %arg1[%25, %c0_16] : memref<56x16xf32, #tpu.memory_space<vmem>>, vector<1x16xf32>
    %c6 = arith.constant 6 : index
    %c0_17 = arith.constant 0 : index
    %27 = vector.load %arg15[%c6, %c0_17] : memref<16x16xf32, #tpu.memory_space<vmem>>, vector<1x16xf32>
    tpu.vector_store %arg15[%c6, %c0_17], %26 {strides = array<i32>} : memref<16x16xf32, #tpu.memory_space<vmem>>, vector<1x16xf32>,
    %c11 = arith.constant 11 : index
    %28 = memref.load %arg0[%c11] : memref<16xi32, #tpu.memory_space<smem>>
    %29 = arith.index_cast %28 : i32 to index
    %c0_18 = arith.constant 0 : index
    %30 = vector.load %arg1[%29, %c0_18] : memref<56x16xf32, #tpu.memory_space<vmem>>, vector<1x16xf32>
    %c7 = arith.constant 7 : index
    %c0_19 = arith.constant 0 : index
    %31 = vector.load %arg15[%c7, %c0_19] : memref<16x16xf32, #tpu.memory_space<vmem>>, vector<1x16xf32>
    tpu.vector_store %arg15[%c7, %c0_19], %30 {strides = array<i32>} : memref<16x16xf32, #tpu.memory_space<vmem>>, vector<1x16xf32>,
    %c4_20 = arith.constant 4 : index
    %32 = memref.load %arg0[%c4_20] : memref<16xi32, #tpu.memory_space<smem>>
    %33 = arith.index_cast %32 : i32 to index
    %c0_21 = arith.constant 0 : index
    %34 = vector.load %arg1[%33, %c0_21] : memref<56x16xf32, #tpu.memory_space<vmem>>, vector<1x16xf32>
    %c8_22 = arith.constant 8 : index
    %c0_23 = arith.constant 0 : index
    %35 = vector.load %arg15[%c8_22, %c0_23] : memref<16x16xf32, #tpu.memory_space<vmem>>, vector<1x16xf32>
    tpu.vector_store %arg15[%c8_22, %c0_23], %34 {strides = array<i32>} : memref<16x16xf32, #tpu.memory_space<vmem>>, vector<1x16xf32>,
    %c12 = arith.constant 12 : index
    %36 = memref.load %arg0[%c12] : memref<16xi32, #tpu.memory_space<smem>>
    %37 = arith.index_cast %36 : i32 to index
    %c0_24 = arith.constant 0 : index
    %38 = vector.load %arg1[%37, %c0_24] : memref<56x16xf32, #tpu.memory_space<vmem>>, vector<1x16xf32>
    %c9_25 = arith.constant 9 : index
    %c0_26 = arith.constant 0 : index
    %39 = vector.load %arg15[%c9_25, %c0_26] : memref<16x16xf32, #tpu.memory_space<vmem>>, vector<1x16xf32>
    tpu.vector_store %arg15[%c9_25, %c0_26], %38 {strides = array<i32>} : memref<16x16xf32, #tpu.memory_space<vmem>>, vector<1x16xf32>,
    %c5_27 = arith.constant 5 : index
    %40 = memref.load %arg0[%c5_27] : memref<16xi32, #tpu.memory_space<smem>>
    %41 = arith.index_cast %40 : i32 to index
    %c0_28 = arith.constant 0 : index
    %42 = vector.load %arg1[%41, %c0_28] : memref<56x16xf32, #tpu.memory_space<vmem>>, vector<1x16xf32>
    %c10_29 = arith.constant 10 : index
    %c0_30 = arith.constant 0 : index
    %43 = vector.load %arg15[%c10_29, %c0_30] : memref<16x16xf32, #tpu.memory_space<vmem>>, vector<1x16xf32>
    tpu.vector_store %arg15[%c10_29, %c0_30], %42 {strides = array<i32>} : memref<16x16xf32, #tpu.memory_space<vmem>>, vector<1x16xf32>,
    %c13 = arith.constant 13 : index
    %44 = memref.load %arg0[%c13] : memref<16xi32, #tpu.memory_space<smem>>
    %45 = arith.index_cast %44 : i32 to index
    %c0_31 = arith.constant 0 : index
    %46 = vector.load %arg1[%45, %c0_31] : memref<56x16xf32, #tpu.memory_space<vmem>>, vector<1x16xf32>
    %c11_32 = arith.constant 11 : index
    %c0_33 = arith.constant 0 : index
    %47 = vector.load %arg15[%c11_32, %c0_33] : memref<16x16xf32, #tpu.memory_space<vmem>>, vector<1x16xf32>
    tpu.vector_store %arg15[%c11_32, %c0_33], %46 {strides = array<i32>} : memref<16x16xf32, #tpu.memory_space<vmem>>, vector<1x16xf32>,
    %c6_34 = arith.constant 6 : index
    %48 = memref.load %arg0[%c6_34] : memref<16xi32, #tpu.memory_space<smem>>
    %49 = arith.index_cast %48 : i32 to index
    %c0_35 = arith.constant 0 : index
    %50 = vector.load %arg1[%49, %c0_35] : memref<56x16xf32, #tpu.memory_space<vmem>>, vector<1x16xf32>
    %c12_36 = arith.constant 12 : index
    %c0_37 = arith.constant 0 : index
    %51 = vector.load %arg15[%c12_36, %c0_37] : memref<16x16xf32, #tpu.memory_space<vmem>>, vector<1x16xf32>
    tpu.vector_store %arg15[%c12_36, %c0_37], %50 {strides = array<i32>} : memref<16x16xf32, #tpu.memory_space<vmem>>, vector<1x16xf32>,
    %c14 = arith.constant 14 : index
    %52 = memref.load %arg0[%c14] : memref<16xi32, #tpu.memory_space<smem>>
    %53 = arith.index_cast %52 : i32 to index
    %c0_38 = arith.constant 0 : index
    %54 = vector.load %arg1[%53, %c0_38] : memref<56x16xf32, #tpu.memory_space<vmem>>, vector<1x16xf32>
    %c13_39 = arith.constant 13 : index
    %c0_40 = arith.constant 0 : index
    %55 = vector.load %arg15[%c13_39, %c0_40] : memref<16x16xf32, #tpu.memory_space<vmem>>, vector<1x16xf32>
    tpu.vector_store %arg15[%c13_39, %c0_40], %54 {strides = array<i32>} : memref<16x16xf32, #tpu.memory_space<vmem>>, vector<1x16xf32>,
    %c7_41 = arith.constant 7 : index
    %56 = memref.load %arg0[%c7_41] : memref<16xi32, #tpu.memory_space<smem>>
    %57 = arith.index_cast %56 : i32 to index
    %c0_42 = arith.constant 0 : index
    %58 = vector.load %arg1[%57, %c0_42] : memref<56x16xf32, #tpu.memory_space<vmem>>, vector<1x16xf32>
    %c14_43 = arith.constant 14 : index
    %c0_44 = arith.constant 0 : index
    %59 = vector.load %arg15[%c14_43, %c0_44] : memref<16x16xf32, #tpu.memory_space<vmem>>, vector<1x16xf32>
    tpu.vector_store %arg15[%c14_43, %c0_44], %58 {strides = array<i32>} : memref<16x16xf32, #tpu.memory_space<vmem>>, vector<1x16xf32>,
    %c15 = arith.constant 15 : index
    %60 = memref.load %arg0[%c15] : memref<16xi32, #tpu.memory_space<smem>>
    %61 = arith.index_cast %60 : i32 to index
    %c0_45 = arith.constant 0 : index
    %62 = vector.load %arg1[%61, %c0_45] : memref<56x16xf32, #tpu.memory_space<vmem>>, vector<1x16xf32>
    %c15_46 = arith.constant 15 : index
    %c0_47 = arith.constant 0 : index
    %63 = vector.load %arg15[%c15_46, %c0_47] : memref<16x16xf32, #tpu.memory_space<vmem>>, vector<1x16xf32>
    tpu.vector_store %arg15[%c15_46, %c0_47], %62 {strides = array<i32>} : memref<16x16xf32, #tpu.memory_space<vmem>>, vector<1x16xf32>,
    %c0_48 = arith.constant 0 : index
    %c0_49 = arith.constant 0 : index
    %64 = vector.load %arg15[%c0_48, %c0_49] : memref<16x16xf32, #tpu.memory_space<vmem>>, vector<16x16xf32>
    %c0_50 = arith.constant 0 : index
    %c0_51 = arith.constant 0 : index
    %65 = vector.load %arg4[%c0_50, %c0_51] : memref<16x128xf32, #tpu.memory_space<vmem>>, vector<16x128xf32>
    %cst = arith.constant dense<0.000000e+00> : vector<16x128xf32>
    %66 = tpu.matmul %64, %65, %cst {dimension_numbers = #tpu.dot_dimension_numbers<[1], [0], [0], [1], [0, 0, 1, 1], [], []>} : vector<16x16xf32>, vector<16x128xf32>, vector<16x128xf32> -> vector<16x128xf32>
    %c0_52 = arith.constant 0 : index
    %c0_53 = arith.constant 0 : index
    %67 = vector.load %arg6[%c0_52, %c0_53] : memref<1x128xf32, #tpu.memory_space<vmem>>, vector<1x128xf32>
    %68 = vector.broadcast %67 : vector<1x128xf32> to vector<16x128xf32>
    %69 = arith.addf %66, %68 : vector<16x128xf32>
    %c0_54 = arith.constant 0 : index
    %c0_55 = arith.constant 0 : index
    %70 = vector.load %arg16[%c0_54, %c0_55] : memref<16x128xf32, #tpu.memory_space<vmem>>, vector<16x128xf32>
    tpu.vector_store %arg16[%c0_54, %c0_55], %69 {strides = array<i32>} : memref<16x128xf32, #tpu.memory_space<vmem>>, vector<16x128xf32>,
    %71 = tpu.iota {dimensions = array<i32: 1>} : vector<1x128xi32>
    %c64_i32 = arith.constant 64 : i32
    %72 = vector.broadcast %c64_i32 : i32 to vector<1x128xi32>
    %73 = arith.cmpi sge, %71, %72 : vector<1x128xi32>
    %c96_i32 = arith.constant 96 : i32
    %74 = vector.broadcast %c96_i32 : i32 to vector<1x128xi32>
    %75 = arith.cmpi slt, %71, %74 : vector<1x128xi32>
    %76 = arith.andi %73, %75 : vector<1x128xi1>
    %cst_56 = arith.constant 2.000000e+00 : f32
    %cst_57 = arith.constant 1.000000e+00 : f32
    %77 = vector.broadcast %cst_56 : f32 to vector<1x128xf32>
    %78 = vector.broadcast %cst_57 : f32 to vector<1x128xf32>
    %79 = arith.select %76, %77, %78 : vector<1x128xi1>, vector<1x128xf32>
    %c0_58 = arith.constant 0 : index
    %c0_59 = arith.constant 0 : index
    %80 = vector.load %arg2[%c0_58, %c0_59] : memref<4x32xf32, #tpu.memory_space<vmem>>, vector<2x32xf32>
    %c2_60 = arith.constant 2 : index
    %c0_61 = arith.constant 0 : index
    %81 = vector.load %arg2[%c2_60, %c0_61] : memref<4x32xf32, #tpu.memory_space<vmem>>, vector<2x32xf32>
    %c0_62 = arith.constant 0 : index
    %c0_63 = arith.constant 0 : index
    %82 = vector.load %arg3[%c0_62, %c0_63] : memref<4x32xf32, #tpu.memory_space<vmem>>, vector<2x32xf32>
    %c2_64 = arith.constant 2 : index
    %c0_65 = arith.constant 0 : index
    %83 = vector.load %arg3[%c2_64, %c0_65] : memref<4x32xf32, #tpu.memory_space<vmem>>, vector<2x32xf32>
    %c0_66 = arith.constant 0 : index
    %c0_67 = arith.constant 0 : index
    %84 = vector.load %arg16[%c0_66, %c0_67] : memref<16x128xf32, #tpu.memory_space<vmem>>, vector<2x128xf32>
    %c0_68 = arith.constant 0 : index
    %c0_69 = arith.constant 0 : index
    %85 = vector.load %arg5[%c0_68, %c0_69] : memref<32x128xf32, #tpu.memory_space<vmem>>, vector<32x128xf32>
    %cst_70 = arith.constant dense<0.000000e+00> : vector<2x128xf32>
    %86 = tpu.matmul %80, %85, %cst_70 {dimension_numbers = #tpu.dot_dimension_numbers<[1], [0], [0], [1], [0, 0, 1, 1], [], []>} : vector<2x32xf32>, vector<32x128xf32>, vector<2x128xf32> -> vector<2x128xf32>
    %87 = arith.addf %84, %86 : vector<2x128xf32>
    %88 = vector.broadcast %79 : vector<1x128xf32> to vector<2x128xf32>
    %89 = arith.mulf %87, %88 : vector<2x128xf32>
    %90 = arith.negf %89 : vector<2x128xf32>
    %91 = math.exp %90 : vector<2x128xf32>
    %cst_71 = arith.constant 1.000000e+00 : f32
    %92 = vector.broadcast %cst_71 : f32 to vector<2x128xf32>
    %93 = arith.addf %92, %91 : vector<2x128xf32>
    %94 = arith.divf %92, %93 : vector<2x128xf32>
    %95 = vector.extract_strided_slice %94 {offsets = [0, 0], sizes = [2, 32], strides = [1, 1]} : vector<2x128xf32> to vector<2x32xf32>
    %96 = vector.extract_strided_slice %94 {offsets = [0, 32], sizes = [2, 32], strides = [1, 1]} : vector<2x128xf32> to vector<2x32xf32>
    %97 = vector.extract_strided_slice %94 {offsets = [0, 64], sizes = [2, 32], strides = [1, 1]} : vector<2x128xf32> to vector<2x32xf32>
    %cst_72 = arith.constant 2.000000e+00 : f32
    %98 = vector.broadcast %cst_72 : f32 to vector<2x32xf32>
    %99 = arith.mulf %98, %97 : vector<2x32xf32>
    %cst_73 = arith.constant 1.000000e+00 : f32
    %100 = vector.broadcast %cst_73 : f32 to vector<2x32xf32>
    %101 = arith.subf %99, %100 : vector<2x32xf32>
    %102 = vector.extract_strided_slice %94 {offsets = [0, 96], sizes = [2, 32], strides = [1, 1]} : vector<2x128xf32> to vector<2x32xf32>
    %103 = arith.mulf %96, %82 : vector<2x32xf32>
    %104 = arith.mulf %95, %101 : vector<2x32xf32>
    %105 = arith.addf %103, %104 : vector<2x32xf32>
    %106 = math.tanh %105 : vector<2x32xf32>
    %107 = arith.mulf %102, %106 : vector<2x32xf32>
    %c2_74 = arith.constant 2 : index
    %c0_75 = arith.constant 0 : index
    %108 = vector.load %arg16[%c2_74, %c0_75] : memref<16x128xf32, #tpu.memory_space<vmem>>, vector<2x128xf32>
    %c0_76 = arith.constant 0 : index
    %c0_77 = arith.constant 0 : index
    %109 = vector.load %arg5[%c0_76, %c0_77] : memref<32x128xf32, #tpu.memory_space<vmem>>, vector<32x128xf32>
    %cst_78 = arith.constant dense<0.000000e+00> : vector<2x128xf32>
    %110 = tpu.matmul %107, %109, %cst_78 {dimension_numbers = #tpu.dot_dimension_numbers<[1], [0], [0], [1], [0, 0, 1, 1], [], []>} : vector<2x32xf32>, vector<32x128xf32>, vector<2x128xf32> -> vector<2x128xf32>
    %111 = arith.addf %108, %110 : vector<2x128xf32>
    %112 = vector.broadcast %79 : vector<1x128xf32> to vector<2x128xf32>
    %113 = arith.mulf %111, %112 : vector<2x128xf32>
    %114 = arith.negf %113 : vector<2x128xf32>
    %115 = math.exp %114 : vector<2x128xf32>
    %cst_79 = arith.constant 1.000000e+00 : f32
    %116 = vector.broadcast %cst_79 : f32 to vector<2x128xf32>
    %117 = arith.addf %116, %115 : vector<2x128xf32>
    %118 = arith.divf %116, %117 : vector<2x128xf32>
    %119 = vector.extract_strided_slice %118 {offsets = [0, 0], sizes = [2, 32], strides = [1, 1]} : vector<2x128xf32> to vector<2x32xf32>
    %120 = vector.extract_strided_slice %118 {offsets = [0, 32], sizes = [2, 32], strides = [1, 1]} : vector<2x128xf32> to vector<2x32xf32>
    %121 = vector.extract_strided_slice %118 {offsets = [0, 64], sizes = [2, 32], strides = [1, 1]} : vector<2x128xf32> to vector<2x32xf32>
    %cst_80 = arith.constant 2.000000e+00 : f32
    %122 = vector.broadcast %cst_80 : f32 to vector<2x32xf32>
    %123 = arith.mulf %122, %121 : vector<2x32xf32>
    %cst_81 = arith.constant 1.000000e+00 : f32
    %124 = vector.broadcast %cst_81 : f32 to vector<2x32xf32>
    %125 = arith.subf %123, %124 : vector<2x32xf32>
    %126 = vector.extract_strided_slice %118 {offsets = [0, 96], sizes = [2, 32], strides = [1, 1]} : vector<2x128xf32> to vector<2x32xf32>
    %127 = arith.mulf %120, %105 : vector<2x32xf32>
    %128 = arith.mulf %119, %125 : vector<2x32xf32>
    %129 = arith.addf %127, %128 : vector<2x32xf32>
    %130 = math.tanh %129 : vector<2x32xf32>
    %131 = arith.mulf %126, %130 : vector<2x32xf32>
    %c0_82 = arith.constant 0 : index
    %c0_83 = arith.constant 0 : index
    %132 = vector.load %arg7[%c0_82, %c0_83] : memref<32x128xf32, #tpu.memory_space<vmem>>, vector<32x128xf32>
    %cst_84 = arith.constant dense<0.000000e+00> : vector<2x128xf32>
    %133 = tpu.matmul %107, %132, %cst_84 {dimension_numbers = #tpu.dot_dimension_numbers<[1], [0], [0], [1], [0, 0, 1, 1], [], []>} : vector<2x32xf32>, vector<32x128xf32>, vector<2x128xf32> -> vector<2x128xf32>
    %c0_85 = arith.constant 0 : index
    %c0_86 = arith.constant 0 : index
    %134 = vector.load %arg9[%c0_85, %c0_86] : memref<1x128xf32, #tpu.memory_space<vmem>>, vector<1x128xf32>
    %135 = vector.broadcast %134 : vector<1x128xf32> to vector<2x128xf32>
    %136 = arith.addf %133, %135 : vector<2x128xf32>
    %c0_87 = arith.constant 0 : index
    %c0_88 = arith.constant 0 : index
    %137 = vector.load %arg8[%c0_87, %c0_88] : memref<32x128xf32, #tpu.memory_space<vmem>>, vector<32x128xf32>
    %cst_89 = arith.constant dense<0.000000e+00> : vector<2x128xf32>
    %138 = tpu.matmul %81, %137, %cst_89 {dimension_numbers = #tpu.dot_dimension_numbers<[1], [0], [0], [1], [0, 0, 1, 1], [], []>} : vector<2x32xf32>, vector<32x128xf32>, vector<2x128xf32> -> vector<2x128xf32>
    %139 = arith.addf %136, %138 : vector<2x128xf32>
    %140 = vector.broadcast %79 : vector<1x128xf32> to vector<2x128xf32>
    %141 = arith.mulf %139, %140 : vector<2x128xf32>
    %142 = arith.negf %141 : vector<2x128xf32>
    %143 = math.exp %142 : vector<2x128xf32>
    %cst_90 = arith.constant 1.000000e+00 : f32
    %144 = vector.broadcast %cst_90 : f32 to vector<2x128xf32>
    %145 = arith.addf %144, %143 : vector<2x128xf32>
    %146 = arith.divf %144, %145 : vector<2x128xf32>
    %147 = vector.extract_strided_slice %146 {offsets = [0, 0], sizes = [2, 32], strides = [1, 1]} : vector<2x128xf32> to vector<2x32xf32>
    %148 = vector.extract_strided_slice %146 {offsets = [0, 32], sizes = [2, 32], strides = [1, 1]} : vector<2x128xf32> to vector<2x32xf32>
    %149 = vector.extract_strided_slice %146 {offsets = [0, 64], sizes = [2, 32], strides = [1, 1]} : vector<2x128xf32> to vector<2x32xf32>
    %cst_91 = arith.constant 2.000000e+00 : f32
    %150 = vector.broadcast %cst_91 : f32 to vector<2x32xf32>
    %151 = arith.mulf %150, %149 : vector<2x32xf32>
    %cst_92 = arith.constant 1.000000e+00 : f32
    %152 = vector.broadcast %cst_92 : f32 to vector<2x32xf32>
    %153 = arith.subf %151, %152 : vector<2x32xf32>
    %154 = vector.extract_strided_slice %146 {offsets = [0, 96], sizes = [2, 32], strides = [1, 1]} : vector<2x128xf32> to vector<2x32xf32>
    %155 = arith.mulf %148, %83 : vector<2x32xf32>
    %156 = arith.mulf %147, %153 : vector<2x32xf32>
    %157 = arith.addf %155, %156 : vector<2x32xf32>
    %158 = math.tanh %157 : vector<2x32xf32>
    %159 = arith.mulf %154, %158 : vector<2x32xf32>
    %c0_93 = arith.constant 0 : index
    %c0_94 = arith.constant 0 : index
    %160 = vector.load %arg17[%c0_93, %c0_94] : memref<2x256xf32, #tpu.memory_space<vmem>>, vector<2x32xf32>
    tpu.vector_store %arg17[%c0_93, %c0_94], %159 {strides = array<i32>} : memref<2x256xf32, #tpu.memory_space<vmem>>, vector<2x32xf32>,
    %c4_95 = arith.constant 4 : index
    %c0_96 = arith.constant 0 : index
    %161 = vector.load %arg16[%c4_95, %c0_96] : memref<16x128xf32, #tpu.memory_space<vmem>>, vector<2x128xf32>
    %c0_97 = arith.constant 0 : index
    %c0_98 = arith.constant 0 : index
    %162 = vector.load %arg5[%c0_97, %c0_98] : memref<32x128xf32, #tpu.memory_space<vmem>>, vector<32x128xf32>
    %cst_99 = arith.constant dense<0.000000e+00> : vector<2x128xf32>
    %163 = tpu.matmul %131, %162, %cst_99 {dimension_numbers = #tpu.dot_dimension_numbers<[1], [0], [0], [1], [0, 0, 1, 1], [], []>} : vector<2x32xf32>, vector<32x128xf32>, vector<2x128xf32> -> vector<2x128xf32>
    %164 = arith.addf %161, %163 : vector<2x128xf32>
    %165 = vector.broadcast %79 : vector<1x128xf32> to vector<2x128xf32>
    %166 = arith.mulf %164, %165 : vector<2x128xf32>
    %167 = arith.negf %166 : vector<2x128xf32>
    %168 = math.exp %167 : vector<2x128xf32>
    %cst_100 = arith.constant 1.000000e+00 : f32
    %169 = vector.broadcast %cst_100 : f32 to vector<2x128xf32>
    %170 = arith.addf %169, %168 : vector<2x128xf32>
    %171 = arith.divf %169, %170 : vector<2x128xf32>
    %172 = vector.extract_strided_slice %171 {offsets = [0, 0], sizes = [2, 32], strides = [1, 1]} : vector<2x128xf32> to vector<2x32xf32>
    %173 = vector.extract_strided_slice %171 {offsets = [0, 32], sizes = [2, 32], strides = [1, 1]} : vector<2x128xf32> to vector<2x32xf32>
    %174 = vector.extract_strided_slice %171 {offsets = [0, 64], sizes = [2, 32], strides = [1, 1]} : vector<2x128xf32> to vector<2x32xf32>
    %cst_101 = arith.constant 2.000000e+00 : f32
    %175 = vector.broadcast %cst_101 : f32 to vector<2x32xf32>
    %176 = arith.mulf %175, %174 : vector<2x32xf32>
    %cst_102 = arith.constant 1.000000e+00 : f32
    %177 = vector.broadcast %cst_102 : f32 to vector<2x32xf32>
    %178 = arith.subf %176, %177 : vector<2x32xf32>
    %179 = vector.extract_strided_slice %171 {offsets = [0, 96], sizes = [2, 32], strides = [1, 1]} : vector<2x128xf32> to vector<2x32xf32>
    %180 = arith.mulf %173, %129 : vector<2x32xf32>
    %181 = arith.mulf %172, %178 : vector<2x32xf32>
    %182 = arith.addf %180, %181 : vector<2x32xf32>
    %183 = math.tanh %182 : vector<2x32xf32>
    %184 = arith.mulf %179, %183 : vector<2x32xf32>
    %c0_103 = arith.constant 0 : index
    %c0_104 = arith.constant 0 : index
    %185 = vector.load %arg7[%c0_103, %c0_104] : memref<32x128xf32, #tpu.memory_space<vmem>>, vector<32x128xf32>
    %cst_105 = arith.constant dense<0.000000e+00> : vector<2x128xf32>
    %186 = tpu.matmul %131, %185, %cst_105 {dimension_numbers = #tpu.dot_dimension_numbers<[1], [0], [0], [1], [0, 0, 1, 1], [], []>} : vector<2x32xf32>, vector<32x128xf32>, vector<2x128xf32> -> vector<2x128xf32>
    %c0_106 = arith.constant 0 : index
    %c0_107 = arith.constant 0 : index
    %187 = vector.load %arg9[%c0_106, %c0_107] : memref<1x128xf32, #tpu.memory_space<vmem>>, vector<1x128xf32>
    %188 = vector.broadcast %187 : vector<1x128xf32> to vector<2x128xf32>
    %189 = arith.addf %186, %188 : vector<2x128xf32>
    %c0_108 = arith.constant 0 : index
    %c0_109 = arith.constant 0 : index
    %190 = vector.load %arg8[%c0_108, %c0_109] : memref<32x128xf32, #tpu.memory_space<vmem>>, vector<32x128xf32>
    %cst_110 = arith.constant dense<0.000000e+00> : vector<2x128xf32>
    %191 = tpu.matmul %159, %190, %cst_110 {dimension_numbers = #tpu.dot_dimension_numbers<[1], [0], [0], [1], [0, 0, 1, 1], [], []>} : vector<2x32xf32>, vector<32x128xf32>, vector<2x128xf32> -> vector<2x128xf32>
    %192 = arith.addf %189, %191 : vector<2x128xf32>
    %193 = vector.broadcast %79 : vector<1x128xf32> to vector<2x128xf32>
    %194 = arith.mulf %192, %193 : vector<2x128xf32>
    %195 = arith.negf %194 : vector<2x128xf32>
    %196 = math.exp %195 : vector<2x128xf32>
    %cst_111 = arith.constant 1.000000e+00 : f32
    %197 = vector.broadcast %cst_111 : f32 to vector<2x128xf32>
    %198 = arith.addf %197, %196 : vector<2x128xf32>
    %199 = arith.divf %197, %198 : vector<2x128xf32>
    %200 = vector.extract_strided_slice %199 {offsets = [0, 0], sizes = [2, 32], strides = [1, 1]} : vector<2x128xf32> to vector<2x32xf32>
    %201 = vector.extract_strided_slice %199 {offsets = [0, 32], sizes = [2, 32], strides = [1, 1]} : vector<2x128xf32> to vector<2x32xf32>
    %202 = vector.extract_strided_slice %199 {offsets = [0, 64], sizes = [2, 32], strides = [1, 1]} : vector<2x128xf32> to vector<2x32xf32>
    %cst_112 = arith.constant 2.000000e+00 : f32
    %203 = vector.broadcast %cst_112 : f32 to vector<2x32xf32>
    %204 = arith.mulf %203, %202 : vector<2x32xf32>
    %cst_113 = arith.constant 1.000000e+00 : f32
    %205 = vector.broadcast %cst_113 : f32 to vector<2x32xf32>
    %206 = arith.subf %204, %205 : vector<2x32xf32>
    %207 = vector.extract_strided_slice %199 {offsets = [0, 96], sizes = [2, 32], strides = [1, 1]} : vector<2x128xf32> to vector<2x32xf32>
    %208 = arith.mulf %201, %157 : vector<2x32xf32>
    %209 = arith.mulf %200, %206 : vector<2x32xf32>
    %210 = arith.addf %208, %209 : vector<2x32xf32>
    %211 = math.tanh %210 : vector<2x32xf32>
    %212 = arith.mulf %207, %211 : vector<2x32xf32>
    %c0_114 = arith.constant 0 : index
    %c32 = arith.constant 32 : index
    %213 = vector.load %arg17[%c0_114, %c32] : memref<2x256xf32, #tpu.memory_space<vmem>>, vector<2x32xf32>
    tpu.vector_store %arg17[%c0_114, %c32], %212 {strides = array<i32>} : memref<2x256xf32, #tpu.memory_space<vmem>>, vector<2x32xf32>,
    %c6_115 = arith.constant 6 : index
    %c0_116 = arith.constant 0 : index
    %214 = vector.load %arg16[%c6_115, %c0_116] : memref<16x128xf32, #tpu.memory_space<vmem>>, vector<2x128xf32>
    %c0_117 = arith.constant 0 : index
    %c0_118 = arith.constant 0 : index
    %215 = vector.load %arg5[%c0_117, %c0_118] : memref<32x128xf32, #tpu.memory_space<vmem>>, vector<32x128xf32>
    %cst_119 = arith.constant dense<0.000000e+00> : vector<2x128xf32>
    %216 = tpu.matmul %184, %215, %cst_119 {dimension_numbers = #tpu.dot_dimension_numbers<[1], [0], [0], [1], [0, 0, 1, 1], [], []>} : vector<2x32xf32>, vector<32x128xf32>, vector<2x128xf32> -> vector<2x128xf32>
    %217 = arith.addf %214, %216 : vector<2x128xf32>
    %218 = vector.broadcast %79 : vector<1x128xf32> to vector<2x128xf32>
    %219 = arith.mulf %217, %218 : vector<2x128xf32>
    %220 = arith.negf %219 : vector<2x128xf32>
    %221 = math.exp %220 : vector<2x128xf32>
    %cst_120 = arith.constant 1.000000e+00 : f32
    %222 = vector.broadcast %cst_120 : f32 to vector<2x128xf32>
    %223 = arith.addf %222, %221 : vector<2x128xf32>
    %224 = arith.divf %222, %223 : vector<2x128xf32>
    %225 = vector.extract_strided_slice %224 {offsets = [0, 0], sizes = [2, 32], strides = [1, 1]} : vector<2x128xf32> to vector<2x32xf32>
    %226 = vector.extract_strided_slice %224 {offsets = [0, 32], sizes = [2, 32], strides = [1, 1]} : vector<2x128xf32> to vector<2x32xf32>
    %227 = vector.extract_strided_slice %224 {offsets = [0, 64], sizes = [2, 32], strides = [1, 1]} : vector<2x128xf32> to vector<2x32xf32>
    %cst_121 = arith.constant 2.000000e+00 : f32
    %228 = vector.broadcast %cst_121 : f32 to vector<2x32xf32>
    %229 = arith.mulf %228, %227 : vector<2x32xf32>
    %cst_122 = arith.constant 1.000000e+00 : f32
    %230 = vector.broadcast %cst_122 : f32 to vector<2x32xf32>
    %231 = arith.subf %229, %230 : vector<2x32xf32>
    %232 = vector.extract_strided_slice %224 {offsets = [0, 96], sizes = [2, 32], strides = [1, 1]} : vector<2x128xf32> to vector<2x32xf32>
    %233 = arith.mulf %226, %182 : vector<2x32xf32>
    %234 = arith.mulf %225, %231 : vector<2x32xf32>
    %235 = arith.addf %233, %234 : vector<2x32xf32>
    %236 = math.tanh %235 : vector<2x32xf32>
    %237 = arith.mulf %232, %236 : vector<2x32xf32>
    %c0_123 = arith.constant 0 : index
    %c0_124 = arith.constant 0 : index
    %238 = vector.load %arg7[%c0_123, %c0_124] : memref<32x128xf32, #tpu.memory_space<vmem>>, vector<32x128xf32>
    %cst_125 = arith.constant dense<0.000000e+00> : vector<2x128xf32>
    %239 = tpu.matmul %184, %238, %cst_125 {dimension_numbers = #tpu.dot_dimension_numbers<[1], [0], [0], [1], [0, 0, 1, 1], [], []>} : vector<2x32xf32>, vector<32x128xf32>, vector<2x128xf32> -> vector<2x128xf32>
    %c0_126 = arith.constant 0 : index
    %c0_127 = arith.constant 0 : index
    %240 = vector.load %arg9[%c0_126, %c0_127] : memref<1x128xf32, #tpu.memory_space<vmem>>, vector<1x128xf32>
    %241 = vector.broadcast %240 : vector<1x128xf32> to vector<2x128xf32>
    %242 = arith.addf %239, %241 : vector<2x128xf32>
    %c0_128 = arith.constant 0 : index
    %c0_129 = arith.constant 0 : index
    %243 = vector.load %arg8[%c0_128, %c0_129] : memref<32x128xf32, #tpu.memory_space<vmem>>, vector<32x128xf32>
    %cst_130 = arith.constant dense<0.000000e+00> : vector<2x128xf32>
    %244 = tpu.matmul %212, %243, %cst_130 {dimension_numbers = #tpu.dot_dimension_numbers<[1], [0], [0], [1], [0, 0, 1, 1], [], []>} : vector<2x32xf32>, vector<32x128xf32>, vector<2x128xf32> -> vector<2x128xf32>
    %245 = arith.addf %242, %244 : vector<2x128xf32>
    %246 = vector.broadcast %79 : vector<1x128xf32> to vector<2x128xf32>
    %247 = arith.mulf %245, %246 : vector<2x128xf32>
    %248 = arith.negf %247 : vector<2x128xf32>
    %249 = math.exp %248 : vector<2x128xf32>
    %cst_131 = arith.constant 1.000000e+00 : f32
    %250 = vector.broadcast %cst_131 : f32 to vector<2x128xf32>
    %251 = arith.addf %250, %249 : vector<2x128xf32>
    %252 = arith.divf %250, %251 : vector<2x128xf32>
    %253 = vector.extract_strided_slice %252 {offsets = [0, 0], sizes = [2, 32], strides = [1, 1]} : vector<2x128xf32> to vector<2x32xf32>
    %254 = vector.extract_strided_slice %252 {offsets = [0, 32], sizes = [2, 32], strides = [1, 1]} : vector<2x128xf32> to vector<2x32xf32>
    %255 = vector.extract_strided_slice %252 {offsets = [0, 64], sizes = [2, 32], strides = [1, 1]} : vector<2x128xf32> to vector<2x32xf32>
    %cst_132 = arith.constant 2.000000e+00 : f32
    %256 = vector.broadcast %cst_132 : f32 to vector<2x32xf32>
    %257 = arith.mulf %256, %255 : vector<2x32xf32>
    %cst_133 = arith.constant 1.000000e+00 : f32
    %258 = vector.broadcast %cst_133 : f32 to vector<2x32xf32>
    %259 = arith.subf %257, %258 : vector<2x32xf32>
    %260 = vector.extract_strided_slice %252 {offsets = [0, 96], sizes = [2, 32], strides = [1, 1]} : vector<2x128xf32> to vector<2x32xf32>
    %261 = arith.mulf %254, %210 : vector<2x32xf32>
    %262 = arith.mulf %253, %259 : vector<2x32xf32>
    %263 = arith.addf %261, %262 : vector<2x32xf32>
    %264 = math.tanh %263 : vector<2x32xf32>
    %265 = arith.mulf %260, %264 : vector<2x32xf32>
    %c0_134 = arith.constant 0 : index
    %c64 = arith.constant 64 : index
    %266 = vector.load %arg17[%c0_134, %c64] : memref<2x256xf32, #tpu.memory_space<vmem>>, vector<2x32xf32>
    tpu.vector_store %arg17[%c0_134, %c64], %265 {strides = array<i32>} : memref<2x256xf32, #tpu.memory_space<vmem>>, vector<2x32xf32>,
    %c8_135 = arith.constant 8 : index
    %c0_136 = arith.constant 0 : index
    %267 = vector.load %arg16[%c8_135, %c0_136] : memref<16x128xf32, #tpu.memory_space<vmem>>, vector<2x128xf32>
    %c0_137 = arith.constant 0 : index
    %c0_138 = arith.constant 0 : index
    %268 = vector.load %arg5[%c0_137, %c0_138] : memref<32x128xf32, #tpu.memory_space<vmem>>, vector<32x128xf32>
    %cst_139 = arith.constant dense<0.000000e+00> : vector<2x128xf32>
    %269 = tpu.matmul %237, %268, %cst_139 {dimension_numbers = #tpu.dot_dimension_numbers<[1], [0], [0], [1], [0, 0, 1, 1], [], []>} : vector<2x32xf32>, vector<32x128xf32>, vector<2x128xf32> -> vector<2x128xf32>
    %270 = arith.addf %267, %269 : vector<2x128xf32>
    %271 = vector.broadcast %79 : vector<1x128xf32> to vector<2x128xf32>
    %272 = arith.mulf %270, %271 : vector<2x128xf32>
    %273 = arith.negf %272 : vector<2x128xf32>
    %274 = math.exp %273 : vector<2x128xf32>
    %cst_140 = arith.constant 1.000000e+00 : f32
    %275 = vector.broadcast %cst_140 : f32 to vector<2x128xf32>
    %276 = arith.addf %275, %274 : vector<2x128xf32>
    %277 = arith.divf %275, %276 : vector<2x128xf32>
    %278 = vector.extract_strided_slice %277 {offsets = [0, 0], sizes = [2, 32], strides = [1, 1]} : vector<2x128xf32> to vector<2x32xf32>
    %279 = vector.extract_strided_slice %277 {offsets = [0, 32], sizes = [2, 32], strides = [1, 1]} : vector<2x128xf32> to vector<2x32xf32>
    %280 = vector.extract_strided_slice %277 {offsets = [0, 64], sizes = [2, 32], strides = [1, 1]} : vector<2x128xf32> to vector<2x32xf32>
    %cst_141 = arith.constant 2.000000e+00 : f32
    %281 = vector.broadcast %cst_141 : f32 to vector<2x32xf32>
    %282 = arith.mulf %281, %280 : vector<2x32xf32>
    %cst_142 = arith.constant 1.000000e+00 : f32
    %283 = vector.broadcast %cst_142 : f32 to vector<2x32xf32>
    %284 = arith.subf %282, %283 : vector<2x32xf32>
    %285 = vector.extract_strided_slice %277 {offsets = [0, 96], sizes = [2, 32], strides = [1, 1]} : vector<2x128xf32> to vector<2x32xf32>
    %286 = arith.mulf %279, %235 : vector<2x32xf32>
    %287 = arith.mulf %278, %284 : vector<2x32xf32>
    %288 = arith.addf %286, %287 : vector<2x32xf32>
    %289 = math.tanh %288 : vector<2x32xf32>
    %290 = arith.mulf %285, %289 : vector<2x32xf32>
    %c0_143 = arith.constant 0 : index
    %c0_144 = arith.constant 0 : index
    %291 = vector.load %arg7[%c0_143, %c0_144] : memref<32x128xf32, #tpu.memory_space<vmem>>, vector<32x128xf32>
    %cst_145 = arith.constant dense<0.000000e+00> : vector<2x128xf32>
    %292 = tpu.matmul %237, %291, %cst_145 {dimension_numbers = #tpu.dot_dimension_numbers<[1], [0], [0], [1], [0, 0, 1, 1], [], []>} : vector<2x32xf32>, vector<32x128xf32>, vector<2x128xf32> -> vector<2x128xf32>
    %c0_146 = arith.constant 0 : index
    %c0_147 = arith.constant 0 : index
    %293 = vector.load %arg9[%c0_146, %c0_147] : memref<1x128xf32, #tpu.memory_space<vmem>>, vector<1x128xf32>
    %294 = vector.broadcast %293 : vector<1x128xf32> to vector<2x128xf32>
    %295 = arith.addf %292, %294 : vector<2x128xf32>
    %c0_148 = arith.constant 0 : index
    %c0_149 = arith.constant 0 : index
    %296 = vector.load %arg8[%c0_148, %c0_149] : memref<32x128xf32, #tpu.memory_space<vmem>>, vector<32x128xf32>
    %cst_150 = arith.constant dense<0.000000e+00> : vector<2x128xf32>
    %297 = tpu.matmul %265, %296, %cst_150 {dimension_numbers = #tpu.dot_dimension_numbers<[1], [0], [0], [1], [0, 0, 1, 1], [], []>} : vector<2x32xf32>, vector<32x128xf32>, vector<2x128xf32> -> vector<2x128xf32>
    %298 = arith.addf %295, %297 : vector<2x128xf32>
    %299 = vector.broadcast %79 : vector<1x128xf32> to vector<2x128xf32>
    %300 = arith.mulf %298, %299 : vector<2x128xf32>
    %301 = arith.negf %300 : vector<2x128xf32>
    %302 = math.exp %301 : vector<2x128xf32>
    %cst_151 = arith.constant 1.000000e+00 : f32
    %303 = vector.broadcast %cst_151 : f32 to vector<2x128xf32>
    %304 = arith.addf %303, %302 : vector<2x128xf32>
    %305 = arith.divf %303, %304 : vector<2x128xf32>
    %306 = vector.extract_strided_slice %305 {offsets = [0, 0], sizes = [2, 32], strides = [1, 1]} : vector<2x128xf32> to vector<2x32xf32>
    %307 = vector.extract_strided_slice %305 {offsets = [0, 32], sizes = [2, 32], strides = [1, 1]} : vector<2x128xf32> to vector<2x32xf32>
    %308 = vector.extract_strided_slice %305 {offsets = [0, 64], sizes = [2, 32], strides = [1, 1]} : vector<2x128xf32> to vector<2x32xf32>
    %cst_152 = arith.constant 2.000000e+00 : f32
    %309 = vector.broadcast %cst_152 : f32 to vector<2x32xf32>
    %310 = arith.mulf %309, %308 : vector<2x32xf32>
    %cst_153 = arith.constant 1.000000e+00 : f32
    %311 = vector.broadcast %cst_153 : f32 to vector<2x32xf32>
    %312 = arith.subf %310, %311 : vector<2x32xf32>
    %313 = vector.extract_strided_slice %305 {offsets = [0, 96], sizes = [2, 32], strides = [1, 1]} : vector<2x128xf32> to vector<2x32xf32>
    %314 = arith.mulf %307, %263 : vector<2x32xf32>
    %315 = arith.mulf %306, %312 : vector<2x32xf32>
    %316 = arith.addf %314, %315 : vector<2x32xf32>
    %317 = math.tanh %316 : vector<2x32xf32>
    %318 = arith.mulf %313, %317 : vector<2x32xf32>
    %c0_154 = arith.constant 0 : index
    %c96 = arith.constant 96 : index
    %319 = vector.load %arg17[%c0_154, %c96] : memref<2x256xf32, #tpu.memory_space<vmem>>, vector<2x32xf32>
    tpu.vector_store %arg17[%c0_154, %c96], %318 {strides = array<i32>} : memref<2x256xf32, #tpu.memory_space<vmem>>, vector<2x32xf32>,
    %c10_155 = arith.constant 10 : index
    %c0_156 = arith.constant 0 : index
    %320 = vector.load %arg16[%c10_155, %c0_156] : memref<16x128xf32, #tpu.memory_space<vmem>>, vector<2x128xf32>
    %c0_157 = arith.constant 0 : index
    %c0_158 = arith.constant 0 : index
    %321 = vector.load %arg5[%c0_157, %c0_158] : memref<32x128xf32, #tpu.memory_space<vmem>>, vector<32x128xf32>
    %cst_159 = arith.constant dense<0.000000e+00> : vector<2x128xf32>
    %322 = tpu.matmul %290, %321, %cst_159 {dimension_numbers = #tpu.dot_dimension_numbers<[1], [0], [0], [1], [0, 0, 1, 1], [], []>} : vector<2x32xf32>, vector<32x128xf32>, vector<2x128xf32> -> vector<2x128xf32>
    %323 = arith.addf %320, %322 : vector<2x128xf32>
    %324 = vector.broadcast %79 : vector<1x128xf32> to vector<2x128xf32>
    %325 = arith.mulf %323, %324 : vector<2x128xf32>
    %326 = arith.negf %325 : vector<2x128xf32>
    %327 = math.exp %326 : vector<2x128xf32>
    %cst_160 = arith.constant 1.000000e+00 : f32
    %328 = vector.broadcast %cst_160 : f32 to vector<2x128xf32>
    %329 = arith.addf %328, %327 : vector<2x128xf32>
    %330 = arith.divf %328, %329 : vector<2x128xf32>
    %331 = vector.extract_strided_slice %330 {offsets = [0, 0], sizes = [2, 32], strides = [1, 1]} : vector<2x128xf32> to vector<2x32xf32>
    %332 = vector.extract_strided_slice %330 {offsets = [0, 32], sizes = [2, 32], strides = [1, 1]} : vector<2x128xf32> to vector<2x32xf32>
    %333 = vector.extract_strided_slice %330 {offsets = [0, 64], sizes = [2, 32], strides = [1, 1]} : vector<2x128xf32> to vector<2x32xf32>
    %cst_161 = arith.constant 2.000000e+00 : f32
    %334 = vector.broadcast %cst_161 : f32 to vector<2x32xf32>
    %335 = arith.mulf %334, %333 : vector<2x32xf32>
    %cst_162 = arith.constant 1.000000e+00 : f32
    %336 = vector.broadcast %cst_162 : f32 to vector<2x32xf32>
    %337 = arith.subf %335, %336 : vector<2x32xf32>
    %338 = vector.extract_strided_slice %330 {offsets = [0, 96], sizes = [2, 32], strides = [1, 1]} : vector<2x128xf32> to vector<2x32xf32>
    %339 = arith.mulf %332, %288 : vector<2x32xf32>
    %340 = arith.mulf %331, %337 : vector<2x32xf32>
    %341 = arith.addf %339, %340 : vector<2x32xf32>
    %342 = math.tanh %341 : vector<2x32xf32>
    %343 = arith.mulf %338, %342 : vector<2x32xf32>
    %c0_163 = arith.constant 0 : index
    %c0_164 = arith.constant 0 : index
    %344 = vector.load %arg7[%c0_163, %c0_164] : memref<32x128xf32, #tpu.memory_space<vmem>>, vector<32x128xf32>
    %cst_165 = arith.constant dense<0.000000e+00> : vector<2x128xf32>
    %345 = tpu.matmul %290, %344, %cst_165 {dimension_numbers = #tpu.dot_dimension_numbers<[1], [0], [0], [1], [0, 0, 1, 1], [], []>} : vector<2x32xf32>, vector<32x128xf32>, vector<2x128xf32> -> vector<2x128xf32>
    %c0_166 = arith.constant 0 : index
    %c0_167 = arith.constant 0 : index
    %346 = vector.load %arg9[%c0_166, %c0_167] : memref<1x128xf32, #tpu.memory_space<vmem>>, vector<1x128xf32>
    %347 = vector.broadcast %346 : vector<1x128xf32> to vector<2x128xf32>
    %348 = arith.addf %345, %347 : vector<2x128xf32>
    %c0_168 = arith.constant 0 : index
    %c0_169 = arith.constant 0 : index
    %349 = vector.load %arg8[%c0_168, %c0_169] : memref<32x128xf32, #tpu.memory_space<vmem>>, vector<32x128xf32>
    %cst_170 = arith.constant dense<0.000000e+00> : vector<2x128xf32>
    %350 = tpu.matmul %318, %349, %cst_170 {dimension_numbers = #tpu.dot_dimension_numbers<[1], [0], [0], [1], [0, 0, 1, 1], [], []>} : vector<2x32xf32>, vector<32x128xf32>, vector<2x128xf32> -> vector<2x128xf32>
    %351 = arith.addf %348, %350 : vector<2x128xf32>
    %352 = vector.broadcast %79 : vector<1x128xf32> to vector<2x128xf32>
    %353 = arith.mulf %351, %352 : vector<2x128xf32>
    %354 = arith.negf %353 : vector<2x128xf32>
    %355 = math.exp %354 : vector<2x128xf32>
    %cst_171 = arith.constant 1.000000e+00 : f32
    %356 = vector.broadcast %cst_171 : f32 to vector<2x128xf32>
    %357 = arith.addf %356, %355 : vector<2x128xf32>
    %358 = arith.divf %356, %357 : vector<2x128xf32>
    %359 = vector.extract_strided_slice %358 {offsets = [0, 0], sizes = [2, 32], strides = [1, 1]} : vector<2x128xf32> to vector<2x32xf32>
    %360 = vector.extract_strided_slice %358 {offsets = [0, 32], sizes = [2, 32], strides = [1, 1]} : vector<2x128xf32> to vector<2x32xf32>
    %361 = vector.extract_strided_slice %358 {offsets = [0, 64], sizes = [2, 32], strides = [1, 1]} : vector<2x128xf32> to vector<2x32xf32>
    %cst_172 = arith.constant 2.000000e+00 : f32
    %362 = vector.broadcast %cst_172 : f32 to vector<2x32xf32>
    %363 = arith.mulf %362, %361 : vector<2x32xf32>
    %cst_173 = arith.constant 1.000000e+00 : f32
    %364 = vector.broadcast %cst_173 : f32 to vector<2x32xf32>
    %365 = arith.subf %363, %364 : vector<2x32xf32>
    %366 = vector.extract_strided_slice %358 {offsets = [0, 96], sizes = [2, 32], strides = [1, 1]} : vector<2x128xf32> to vector<2x32xf32>
    %367 = arith.mulf %360, %316 : vector<2x32xf32>
    %368 = arith.mulf %359, %365 : vector<2x32xf32>
    %369 = arith.addf %367, %368 : vector<2x32xf32>
    %370 = math.tanh %369 : vector<2x32xf32>
    %371 = arith.mulf %366, %370 : vector<2x32xf32>
    %c0_174 = arith.constant 0 : index
    %c128 = arith.constant 128 : index
    %372 = vector.load %arg17[%c0_174, %c128] : memref<2x256xf32, #tpu.memory_space<vmem>>, vector<2x32xf32>
    tpu.vector_store %arg17[%c0_174, %c128], %371 {strides = array<i32>} : memref<2x256xf32, #tpu.memory_space<vmem>>, vector<2x32xf32>,
    %c12_175 = arith.constant 12 : index
    %c0_176 = arith.constant 0 : index
    %373 = vector.load %arg16[%c12_175, %c0_176] : memref<16x128xf32, #tpu.memory_space<vmem>>, vector<2x128xf32>
    %c0_177 = arith.constant 0 : index
    %c0_178 = arith.constant 0 : index
    %374 = vector.load %arg5[%c0_177, %c0_178] : memref<32x128xf32, #tpu.memory_space<vmem>>, vector<32x128xf32>
    %cst_179 = arith.constant dense<0.000000e+00> : vector<2x128xf32>
    %375 = tpu.matmul %343, %374, %cst_179 {dimension_numbers = #tpu.dot_dimension_numbers<[1], [0], [0], [1], [0, 0, 1, 1], [], []>} : vector<2x32xf32>, vector<32x128xf32>, vector<2x128xf32> -> vector<2x128xf32>
    %376 = arith.addf %373, %375 : vector<2x128xf32>
    %377 = vector.broadcast %79 : vector<1x128xf32> to vector<2x128xf32>
    %378 = arith.mulf %376, %377 : vector<2x128xf32>
    %379 = arith.negf %378 : vector<2x128xf32>
    %380 = math.exp %379 : vector<2x128xf32>
    %cst_180 = arith.constant 1.000000e+00 : f32
    %381 = vector.broadcast %cst_180 : f32 to vector<2x128xf32>
    %382 = arith.addf %381, %380 : vector<2x128xf32>
    %383 = arith.divf %381, %382 : vector<2x128xf32>
    %384 = vector.extract_strided_slice %383 {offsets = [0, 0], sizes = [2, 32], strides = [1, 1]} : vector<2x128xf32> to vector<2x32xf32>
    %385 = vector.extract_strided_slice %383 {offsets = [0, 32], sizes = [2, 32], strides = [1, 1]} : vector<2x128xf32> to vector<2x32xf32>
    %386 = vector.extract_strided_slice %383 {offsets = [0, 64], sizes = [2, 32], strides = [1, 1]} : vector<2x128xf32> to vector<2x32xf32>
    %cst_181 = arith.constant 2.000000e+00 : f32
    %387 = vector.broadcast %cst_181 : f32 to vector<2x32xf32>
    %388 = arith.mulf %387, %386 : vector<2x32xf32>
    %cst_182 = arith.constant 1.000000e+00 : f32
    %389 = vector.broadcast %cst_182 : f32 to vector<2x32xf32>
    %390 = arith.subf %388, %389 : vector<2x32xf32>
    %391 = vector.extract_strided_slice %383 {offsets = [0, 96], sizes = [2, 32], strides = [1, 1]} : vector<2x128xf32> to vector<2x32xf32>
    %392 = arith.mulf %385, %341 : vector<2x32xf32>
    %393 = arith.mulf %384, %390 : vector<2x32xf32>
    %394 = arith.addf %392, %393 : vector<2x32xf32>
    %395 = math.tanh %394 : vector<2x32xf32>
    %396 = arith.mulf %391, %395 : vector<2x32xf32>
    %c0_183 = arith.constant 0 : index
    %c0_184 = arith.constant 0 : index
    %397 = vector.load %arg7[%c0_183, %c0_184] : memref<32x128xf32, #tpu.memory_space<vmem>>, vector<32x128xf32>
    %cst_185 = arith.constant dense<0.000000e+00> : vector<2x128xf32>
    %398 = tpu.matmul %343, %397, %cst_185 {dimension_numbers = #tpu.dot_dimension_numbers<[1], [0], [0], [1], [0, 0, 1, 1], [], []>} : vector<2x32xf32>, vector<32x128xf32>, vector<2x128xf32> -> vector<2x128xf32>
    %c0_186 = arith.constant 0 : index
    %c0_187 = arith.constant 0 : index
    %399 = vector.load %arg9[%c0_186, %c0_187] : memref<1x128xf32, #tpu.memory_space<vmem>>, vector<1x128xf32>
    %400 = vector.broadcast %399 : vector<1x128xf32> to vector<2x128xf32>
    %401 = arith.addf %398, %400 : vector<2x128xf32>
    %c0_188 = arith.constant 0 : index
    %c0_189 = arith.constant 0 : index
    %402 = vector.load %arg8[%c0_188, %c0_189] : memref<32x128xf32, #tpu.memory_space<vmem>>, vector<32x128xf32>
    %cst_190 = arith.constant dense<0.000000e+00> : vector<2x128xf32>
    %403 = tpu.matmul %371, %402, %cst_190 {dimension_numbers = #tpu.dot_dimension_numbers<[1], [0], [0], [1], [0, 0, 1, 1], [], []>} : vector<2x32xf32>, vector<32x128xf32>, vector<2x128xf32> -> vector<2x128xf32>
    %404 = arith.addf %401, %403 : vector<2x128xf32>
    %405 = vector.broadcast %79 : vector<1x128xf32> to vector<2x128xf32>
    %406 = arith.mulf %404, %405 : vector<2x128xf32>
    %407 = arith.negf %406 : vector<2x128xf32>
    %408 = math.exp %407 : vector<2x128xf32>
    %cst_191 = arith.constant 1.000000e+00 : f32
    %409 = vector.broadcast %cst_191 : f32 to vector<2x128xf32>
    %410 = arith.addf %409, %408 : vector<2x128xf32>
    %411 = arith.divf %409, %410 : vector<2x128xf32>
    %412 = vector.extract_strided_slice %411 {offsets = [0, 0], sizes = [2, 32], strides = [1, 1]} : vector<2x128xf32> to vector<2x32xf32>
    %413 = vector.extract_strided_slice %411 {offsets = [0, 32], sizes = [2, 32], strides = [1, 1]} : vector<2x128xf32> to vector<2x32xf32>
    %414 = vector.extract_strided_slice %411 {offsets = [0, 64], sizes = [2, 32], strides = [1, 1]} : vector<2x128xf32> to vector<2x32xf32>
    %cst_192 = arith.constant 2.000000e+00 : f32
    %415 = vector.broadcast %cst_192 : f32 to vector<2x32xf32>
    %416 = arith.mulf %415, %414 : vector<2x32xf32>
    %cst_193 = arith.constant 1.000000e+00 : f32
    %417 = vector.broadcast %cst_193 : f32 to vector<2x32xf32>
    %418 = arith.subf %416, %417 : vector<2x32xf32>
    %419 = vector.extract_strided_slice %411 {offsets = [0, 96], sizes = [2, 32], strides = [1, 1]} : vector<2x128xf32> to vector<2x32xf32>
    %420 = arith.mulf %413, %369 : vector<2x32xf32>
    %421 = arith.mulf %412, %418 : vector<2x32xf32>
    %422 = arith.addf %420, %421 : vector<2x32xf32>
    %423 = math.tanh %422 : vector<2x32xf32>
    %424 = arith.mulf %419, %423 : vector<2x32xf32>
    %c0_194 = arith.constant 0 : index
    %c160 = arith.constant 160 : index
    %425 = vector.load %arg17[%c0_194, %c160] : memref<2x256xf32, #tpu.memory_space<vmem>>, vector<2x32xf32>
    tpu.vector_store %arg17[%c0_194, %c160], %424 {strides = array<i32>} : memref<2x256xf32, #tpu.memory_space<vmem>>, vector<2x32xf32>,
    %c14_195 = arith.constant 14 : index
    %c0_196 = arith.constant 0 : index
    %426 = vector.load %arg16[%c14_195, %c0_196] : memref<16x128xf32, #tpu.memory_space<vmem>>, vector<2x128xf32>
    %c0_197 = arith.constant 0 : index
    %c0_198 = arith.constant 0 : index
    %427 = vector.load %arg5[%c0_197, %c0_198] : memref<32x128xf32, #tpu.memory_space<vmem>>, vector<32x128xf32>
    %cst_199 = arith.constant dense<0.000000e+00> : vector<2x128xf32>
    %428 = tpu.matmul %396, %427, %cst_199 {dimension_numbers = #tpu.dot_dimension_numbers<[1], [0], [0], [1], [0, 0, 1, 1], [], []>} : vector<2x32xf32>, vector<32x128xf32>, vector<2x128xf32> -> vector<2x128xf32>
    %429 = arith.addf %426, %428 : vector<2x128xf32>
    %430 = vector.broadcast %79 : vector<1x128xf32> to vector<2x128xf32>
    %431 = arith.mulf %429, %430 : vector<2x128xf32>
    %432 = arith.negf %431 : vector<2x128xf32>
    %433 = math.exp %432 : vector<2x128xf32>
    %cst_200 = arith.constant 1.000000e+00 : f32
    %434 = vector.broadcast %cst_200 : f32 to vector<2x128xf32>
    %435 = arith.addf %434, %433 : vector<2x128xf32>
    %436 = arith.divf %434, %435 : vector<2x128xf32>
    %437 = vector.extract_strided_slice %436 {offsets = [0, 0], sizes = [2, 32], strides = [1, 1]} : vector<2x128xf32> to vector<2x32xf32>
    %438 = vector.extract_strided_slice %436 {offsets = [0, 32], sizes = [2, 32], strides = [1, 1]} : vector<2x128xf32> to vector<2x32xf32>
    %439 = vector.extract_strided_slice %436 {offsets = [0, 64], sizes = [2, 32], strides = [1, 1]} : vector<2x128xf32> to vector<2x32xf32>
    %cst_201 = arith.constant 2.000000e+00 : f32
    %440 = vector.broadcast %cst_201 : f32 to vector<2x32xf32>
    %441 = arith.mulf %440, %439 : vector<2x32xf32>
    %cst_202 = arith.constant 1.000000e+00 : f32
    %442 = vector.broadcast %cst_202 : f32 to vector<2x32xf32>
    %443 = arith.subf %441, %442 : vector<2x32xf32>
    %444 = vector.extract_strided_slice %436 {offsets = [0, 96], sizes = [2, 32], strides = [1, 1]} : vector<2x128xf32> to vector<2x32xf32>
    %445 = arith.mulf %438, %394 : vector<2x32xf32>
    %446 = arith.mulf %437, %443 : vector<2x32xf32>
    %447 = arith.addf %445, %446 : vector<2x32xf32>
    %448 = math.tanh %447 : vector<2x32xf32>
    %449 = arith.mulf %444, %448 : vector<2x32xf32>
    %c0_203 = arith.constant 0 : index
    %c0_204 = arith.constant 0 : index
    %450 = vector.load %arg7[%c0_203, %c0_204] : memref<32x128xf32, #tpu.memory_space<vmem>>, vector<32x128xf32>
    %cst_205 = arith.constant dense<0.000000e+00> : vector<2x128xf32>
    %451 = tpu.matmul %396, %450, %cst_205 {dimension_numbers = #tpu.dot_dimension_numbers<[1], [0], [0], [1], [0, 0, 1, 1], [], []>} : vector<2x32xf32>, vector<32x128xf32>, vector<2x128xf32> -> vector<2x128xf32>
    %c0_206 = arith.constant 0 : index
    %c0_207 = arith.constant 0 : index
    %452 = vector.load %arg9[%c0_206, %c0_207] : memref<1x128xf32, #tpu.memory_space<vmem>>, vector<1x128xf32>
    %453 = vector.broadcast %452 : vector<1x128xf32> to vector<2x128xf32>
    %454 = arith.addf %451, %453 : vector<2x128xf32>
    %c0_208 = arith.constant 0 : index
    %c0_209 = arith.constant 0 : index
    %455 = vector.load %arg8[%c0_208, %c0_209] : memref<32x128xf32, #tpu.memory_space<vmem>>, vector<32x128xf32>
    %cst_210 = arith.constant dense<0.000000e+00> : vector<2x128xf32>
    %456 = tpu.matmul %424, %455, %cst_210 {dimension_numbers = #tpu.dot_dimension_numbers<[1], [0], [0], [1], [0, 0, 1, 1], [], []>} : vector<2x32xf32>, vector<32x128xf32>, vector<2x128xf32> -> vector<2x128xf32>
    %457 = arith.addf %454, %456 : vector<2x128xf32>
    %458 = vector.broadcast %79 : vector<1x128xf32> to vector<2x128xf32>
    %459 = arith.mulf %457, %458 : vector<2x128xf32>
    %460 = arith.negf %459 : vector<2x128xf32>
    %461 = math.exp %460 : vector<2x128xf32>
    %cst_211 = arith.constant 1.000000e+00 : f32
    %462 = vector.broadcast %cst_211 : f32 to vector<2x128xf32>
    %463 = arith.addf %462, %461 : vector<2x128xf32>
    %464 = arith.divf %462, %463 : vector<2x128xf32>
    %465 = vector.extract_strided_slice %464 {offsets = [0, 0], sizes = [2, 32], strides = [1, 1]} : vector<2x128xf32> to vector<2x32xf32>
    %466 = vector.extract_strided_slice %464 {offsets = [0, 32], sizes = [2, 32], strides = [1, 1]} : vector<2x128xf32> to vector<2x32xf32>
    %467 = vector.extract_strided_slice %464 {offsets = [0, 64], sizes = [2, 32], strides = [1, 1]} : vector<2x128xf32> to vector<2x32xf32>
    %cst_212 = arith.constant 2.000000e+00 : f32
    %468 = vector.broadcast %cst_212 : f32 to vector<2x32xf32>
    %469 = arith.mulf %468, %467 : vector<2x32xf32>
    %cst_213 = arith.constant 1.000000e+00 : f32
    %470 = vector.broadcast %cst_213 : f32 to vector<2x32xf32>
    %471 = arith.subf %469, %470 : vector<2x32xf32>
    %472 = vector.extract_strided_slice %464 {offsets = [0, 96], sizes = [2, 32], strides = [1, 1]} : vector<2x128xf32> to vector<2x32xf32>
    %473 = arith.mulf %466, %422 : vector<2x32xf32>
    %474 = arith.mulf %465, %471 : vector<2x32xf32>
    %475 = arith.addf %473, %474 : vector<2x32xf32>
    %476 = math.tanh %475 : vector<2x32xf32>
    %477 = arith.mulf %472, %476 : vector<2x32xf32>
    %c0_214 = arith.constant 0 : index
    %c192 = arith.constant 192 : index
    %478 = vector.load %arg17[%c0_214, %c192] : memref<2x256xf32, #tpu.memory_space<vmem>>, vector<2x32xf32>
    tpu.vector_store %arg17[%c0_214, %c192], %477 {strides = array<i32>} : memref<2x256xf32, #tpu.memory_space<vmem>>, vector<2x32xf32>,
    %c0_215 = arith.constant 0 : index
    %c0_216 = arith.constant 0 : index
    %479 = vector.load %arg7[%c0_215, %c0_216] : memref<32x128xf32, #tpu.memory_space<vmem>>, vector<32x128xf32>
    %cst_217 = arith.constant dense<0.000000e+00> : vector<2x128xf32>
    %480 = tpu.matmul %449, %479, %cst_217 {dimension_numbers = #tpu.dot_dimension_numbers<[1], [0], [0], [1], [0, 0, 1, 1], [], []>} : vector<2x32xf32>, vector<32x128xf32>, vector<2x128xf32> -> vector<2x128xf32>
    %c0_218 = arith.constant 0 : index
    %c0_219 = arith.constant 0 : index
    %481 = vector.load %arg9[%c0_218, %c0_219] : memref<1x128xf32, #tpu.memory_space<vmem>>, vector<1x128xf32>
    %482 = vector.broadcast %481 : vector<1x128xf32> to vector<2x128xf32>
    %483 = arith.addf %480, %482 : vector<2x128xf32>
    %c0_220 = arith.constant 0 : index
    %c0_221 = arith.constant 0 : index
    %484 = vector.load %arg8[%c0_220, %c0_221] : memref<32x128xf32, #tpu.memory_space<vmem>>, vector<32x128xf32>
    %cst_222 = arith.constant dense<0.000000e+00> : vector<2x128xf32>
    %485 = tpu.matmul %477, %484, %cst_222 {dimension_numbers = #tpu.dot_dimension_numbers<[1], [0], [0], [1], [0, 0, 1, 1], [], []>} : vector<2x32xf32>, vector<32x128xf32>, vector<2x128xf32> -> vector<2x128xf32>
    %486 = arith.addf %483, %485 : vector<2x128xf32>
    %487 = vector.broadcast %79 : vector<1x128xf32> to vector<2x128xf32>
    %488 = arith.mulf %486, %487 : vector<2x128xf32>
    %489 = arith.negf %488 : vector<2x128xf32>
    %490 = math.exp %489 : vector<2x128xf32>
    %cst_223 = arith.constant 1.000000e+00 : f32
    %491 = vector.broadcast %cst_223 : f32 to vector<2x128xf32>
    %492 = arith.addf %491, %490 : vector<2x128xf32>
    %493 = arith.divf %491, %492 : vector<2x128xf32>
    %494 = vector.extract_strided_slice %493 {offsets = [0, 0], sizes = [2, 32], strides = [1, 1]} : vector<2x128xf32> to vector<2x32xf32>
    %495 = vector.extract_strided_slice %493 {offsets = [0, 32], sizes = [2, 32], strides = [1, 1]} : vector<2x128xf32> to vector<2x32xf32>
    %496 = vector.extract_strided_slice %493 {offsets = [0, 64], sizes = [2, 32], strides = [1, 1]} : vector<2x128xf32> to vector<2x32xf32>
    %cst_224 = arith.constant 2.000000e+00 : f32
    %497 = vector.broadcast %cst_224 : f32 to vector<2x32xf32>
    %498 = arith.mulf %497, %496 : vector<2x32xf32>
    %cst_225 = arith.constant 1.000000e+00 : f32
    %499 = vector.broadcast %cst_225 : f32 to vector<2x32xf32>
    %500 = arith.subf %498, %499 : vector<2x32xf32>
    %501 = vector.extract_strided_slice %493 {offsets = [0, 96], sizes = [2, 32], strides = [1, 1]} : vector<2x128xf32> to vector<2x32xf32>
    %502 = arith.mulf %495, %475 : vector<2x32xf32>
    %503 = arith.mulf %494, %500 : vector<2x32xf32>
    %504 = arith.addf %502, %503 : vector<2x32xf32>
    %505 = math.tanh %504 : vector<2x32xf32>
    %506 = arith.mulf %501, %505 : vector<2x32xf32>
    %c0_226 = arith.constant 0 : index
    %c224 = arith.constant 224 : index
    %507 = vector.load %arg17[%c0_226, %c224] : memref<2x256xf32, #tpu.memory_space<vmem>>, vector<2x32xf32>
    tpu.vector_store %arg17[%c0_226, %c224], %506 {strides = array<i32>} : memref<2x256xf32, #tpu.memory_space<vmem>>, vector<2x32xf32>,
    %c0_227 = arith.constant 0 : index
    %c0_228 = arith.constant 0 : index
    %508 = vector.load %arg13[%c0_227, %c0_228] : memref<4x32xf32, #tpu.memory_space<vmem>>, vector<2x32xf32>
    tpu.vector_store %arg13[%c0_227, %c0_228], %449 {strides = array<i32>} : memref<4x32xf32, #tpu.memory_space<vmem>>, vector<2x32xf32>,
    %c0_229 = arith.constant 0 : index
    %c0_230 = arith.constant 0 : index
    %509 = vector.load %arg14[%c0_229, %c0_230] : memref<4x32xf32, #tpu.memory_space<vmem>>, vector<2x32xf32>
    tpu.vector_store %arg14[%c0_229, %c0_230], %447 {strides = array<i32>} : memref<4x32xf32, #tpu.memory_space<vmem>>, vector<2x32xf32>,
    %c2_231 = arith.constant 2 : index
    %c0_232 = arith.constant 0 : index
    %510 = vector.load %arg13[%c2_231, %c0_232] : memref<4x32xf32, #tpu.memory_space<vmem>>, vector<2x32xf32>
    tpu.vector_store %arg13[%c2_231, %c0_232], %506 {strides = array<i32>} : memref<4x32xf32, #tpu.memory_space<vmem>>, vector<2x32xf32>,
    %c2_233 = arith.constant 2 : index
    %c0_234 = arith.constant 0 : index
    %511 = vector.load %arg14[%c2_233, %c0_234] : memref<4x32xf32, #tpu.memory_space<vmem>>, vector<2x32xf32>
    tpu.vector_store %arg14[%c2_233, %c0_234], %504 {strides = array<i32>} : memref<4x32xf32, #tpu.memory_space<vmem>>, vector<2x32xf32>,
    %c0_235 = arith.constant 0 : index
    %c0_236 = arith.constant 0 : index
    %512 = vector.load %arg17[%c0_235, %c0_236] : memref<2x256xf32, #tpu.memory_space<vmem>>, vector<2x256xf32>
    %c0_237 = arith.constant 0 : index
    %c0_238 = arith.constant 0 : index
    %513 = vector.load %arg10[%c0_237, %c0_238] : memref<256x4xf32, #tpu.memory_space<vmem>>, vector<256x4xf32>
    %cst_239 = arith.constant dense<0.000000e+00> : vector<2x4xf32>
    %514 = tpu.matmul %512, %513, %cst_239 {dimension_numbers = #tpu.dot_dimension_numbers<[1], [0], [0], [1], [0, 0, 1, 1], [], []>} : vector<2x256xf32>, vector<256x4xf32>, vector<2x4xf32> -> vector<2x4xf32>
    %c0_240 = arith.constant 0 : index
    %c0_241 = arith.constant 0 : index
    %515 = vector.load %arg11[%c0_240, %c0_241] : memref<1x4xf32, #tpu.memory_space<vmem>>, vector<1x4xf32>
    %516 = vector.broadcast %515 : vector<1x4xf32> to vector<2x4xf32>
    %517 = arith.addf %514, %516 : vector<2x4xf32>
    %518 = arith.negf %517 : vector<2x4xf32>
    %519 = math.exp %518 : vector<2x4xf32>
    %cst_242 = arith.constant 1.000000e+00 : f32
    %520 = vector.broadcast %cst_242 : f32 to vector<2x4xf32>
    %521 = arith.addf %520, %519 : vector<2x4xf32>
    %522 = arith.divf %520, %521 : vector<2x4xf32>
    %c0_243 = arith.constant 0 : index
    %c0_244 = arith.constant 0 : index
    %523 = vector.load %arg12[%c0_243, %c0_244] : memref<2x4xf32, #tpu.memory_space<vmem>>, vector<2x4xf32>
    tpu.vector_store %arg12[%c0_243, %c0_244], %522 {strides = array<i32>} : memref<2x4xf32, #tpu.memory_space<vmem>>, vector<2x4xf32>,
    return
  }
}

</mosaic_0001>

<bundles_post_ra>
// kernel: recurrent_net_forward.1
= control target key start
LH: loop header
LB: loop body
LE: loop exit
PB: predicated region body
PF: predicated region fallthrough
CT: control target
= control target key end

     0   :  { %20 = vsyncpa [#allocation7], 0  ;;  %s4428_s0 = inlined_call_operand.vmem [shape: s32[16], index: 0, kind: input, shape index: {}]   ;;  %s4429_s1 = inlined_call_operand.vmem [shape: f32[56,16], index: 1, kind: input, shape index: {}]   ;;  %s4430_s2 = inlined_call_operand.vmem [shape: f32[4,32], index: 2, kind: input, shape index: {}]   ;;  %s4431_s3 = inlined_call_operand.vmem [shape: f32[4,32], index: 3, kind: input, shape index: {}]   ;;  %s4432_s4 = inlined_call_operand.vmem [shape: f32[16,128], index: 4, kind: input, shape index: {}]   ;;  %s4433_s5 = inlined_call_operand.vmem [shape: f32[32,128], index: 5, kind: input, shape index: {}]   ;;  %s4434_s6 = inlined_call_operand.vmem [shape: f32[1,128], index: 6, kind: input, shape index: {}]   ;;  %s4435_s7 = inlined_call_operand.vmem [shape: f32[32,128], index: 7, kind: input, shape index: {}]   ;;  %s4436_s8 = inlined_call_operand.vmem [shape: f32[32,128], index: 8, kind: input, shape index: {}]   ;;  %s4437_s9 = inlined_call_operand.vmem [shape: f32[1,128], index: 9, kind: input, shape index: {}]   ;;  %s4438_s10 = inlined_call_operand.vmem [shape: f32[256,4], index: 10, kind: input, shape index: {}]   ;;  %s4439_s11 = inlined_call_operand.vmem [shape: f32[1,4], index: 11, kind: input, shape index: {}]   ;;  %s4440_s12 = inlined_call_operand.hbm [shape: f32[2,4], index: 12, kind: output, shape index: {0}]   ;;  %s4441_s13 = inlined_call_operand.hbm [shape: f32[4,32], index: 13, kind: output, shape index: {1}]   ;;  %s4442_s14 = inlined_call_operand.hbm [shape: f32[4,32], index: 14, kind: output, shape index: {2}]  }
   0x1   :  { %21 = vsyncpa [#allocation6], 0 }
   0x2   :  { %22 = vsyncpa [#allocation10], 0  ;;  %s29_s15 = sshll.u32 %s4428_s0, 4  ;;  %s30_s15 = int_to_ptr.vmem [resolvable:$true] %s29_s15 }
   0x3   :  { %s3489_s16 = scalar_lea.vmem %s30_s15, 16  ;;  %p3494_p1 = scmp.lt.s32.totalorder %s30_s15, %s30_s15 }
   0x4   :  { %p3490_p0 = scmp.ne.s32.totalorder %s30_s15, %s3489_s16  ;;  %p3495_p2 = scmp.lt.s32.totalorder %s3489_s16, %s3489_s16 }
   0x6   :  { %p3496_p3 = por %p3495_p2, %p3494_p1 }
   0x8   :  { %p3497_p4 = pnand %p3496_p3, %p3490_p0 }
   0xa   :  { %3500 = shalt.err (!%p3497_p4)
}
   0xb   :  { %s3567_s17 = smov [#allocation5]  }
   0xc   :  { %32 = dma.vmem_to_smem %s30_s15, 16, %s3567_s17, [#allocation7]  }
   0xd   :  { %3561 = dma.done.wait [#allocation7], 16  }
   0xe   :  { %3562 = vsyncadd [#allocation7], 4294967280 }
   0xf   :  { %58 = sfence }
  0x10   :  { %v127_v0 = vld [vmem:[%s4432_s4 + $0x8] sm:$0xff]  ;;  %v126_v1 = vld [vmem:[%s4432_s4] sm:$0xff]  ;;  %s59_s0 = sld [smem:[#allocation5]]  ;;  %v3667_v2 = vld [vmem:[%s4433_s5 + $0x18] sm:$0xff]  ;;  %v3568_v3 = vmov 0.0   ;;  %vm62_vm0 = vcmask 122880   ;;  %v219_v27 = vlaneseq }
  0x11   :  { %3107 = vmatprep.subr.mxu0 %v127_v0  ;;  %s2863_s22 = sld [smem:[#allocation5 + $0x8]]  ;;  %3158 = vmatprep.subr.mxu1 %v3568_v3  ;;  %v3678_v4 = vld [vmem:[%s4433_s5 + $0x10] sm:$0xff]  ;;  %v3693_v5 = vld [vmem:[%s4433_s5 + $0x8] sm:$0xff]  ;;  %vm3569_vm1 = vmmov 0   ;;  %v3714_v8 = vld [vmem:[%s4433_s5] sm:$0xff]  ;;  %vm135_vm2 = vcmask 130048  }
  0x12   :  { %3108 = vmatpush3.msra.mxu0 %v127_v0  ;;  %s3662_s23 = sld [smem:[#allocation5 + $0x1]]  ;;  %3159 = vmatpush3.msra.mxu1 %v3667_v2  ;;  %v225_v25 = vld [vmem:[%s4430_s2] sm:$0x3]  ;;  %vm234_vm3 = vcmask 261120   ;;  %v220_v31 = vand.u32 127, %v219_v27  ;;  %v3570_v35 = vmov 1.0  }
  0x13   :  { %3109 = vmatprep.subr.mxu0 %v126_v1  ;;  %s3670_s26 = sld [smem:[#allocation5 + $0x9]]  ;;  %3160 = vmatprep.subr.mxu1 %v3568_v3  ;;  %v2878_v26 = vld [vmem:[%s4434_s6] ss:$0 sm:$0xff]  ;;  %s3571_s6 = smov 64   ;;  %v3824_v56 = vld [vmem:[%s4435_s7 + $0x18] sm:$0xff]  ;;  %v3830_v58 = vld [vmem:[%s4435_s7 + $0x10] sm:$0xff] }
  0x14   :  { %3110 = vmatpush3.msra.mxu0 %v126_v1  ;;  %s3673_s4 = sld [smem:[#allocation5 + $0x2]]  ;;  %3161 = vmatpush3.msra.mxu1 %v3678_v4  ;;  %vm221_vm4 = vcmp.ge.s32.totalorder %v220_v31, 64  ;;  %vm222_vm5 = vcmp.lt.s32.totalorder %v220_v31, 96  ;;  %v227_v46 = vld [vmem:[%s4431_s3] sm:$0x3]  ;;  %v3839_v59 = vld [vmem:[%s4435_s7 + $0x8] sm:$0xff] }
  0x15   :  { %s3681_s29 = sld [smem:[#allocation5 + $0xa]]  ;;  %3114 = vmatprep.subr.mxu0 %v3568_v3  ;;  %3162 = vmatprep.subr.mxu1 %v3568_v3  ;;  %vm223_vm6 = vmand %vm221_vm4, %vm222_vm5  ;;  %v3846_v60 = vld [vmem:[%s4435_s7] sm:$0xff]  ;;  %v3853_v61 = vld [vmem:[%s4436_s8 + $0x18] sm:$0xff]  ;;  %vm642_vm7 = vcmask 254976   ;;  %vm948_vm8 = vcmask 517376   ;;  %vm1254_vm9 = vcmask 779776  }
  0x16   :  { %s60_s16 = scalar_lea.vmem %s4429_s1, %s59_s0  ;;  %s3688_s17 = sld [smem:[#allocation5 + $0x3]]  ;;  %3166 = vmatprep.mubr.msk.f32.mxu1 %vm3569_vm1, %v3568_v3  ;;  %3163 = vmatpush3.msra.mxu1 %v3693_v5  ;;  %v3807_v36 = vsel %vm223_vm6, 2.0, %v3570_v35  ;;  %v3861_v62 = vld [vmem:[%s4436_s8 + $0x10] sm:$0xff]  ;;  %v3870_v63 = vld [vmem:[%s4436_s8 + $0x8] sm:$0xff]  ;;  %v3877_v0 = vld [vmem:[%s4436_s8] sm:$0xff]  ;;  %vm1549_vm10 = vcmask 1042176  }
  0x17   :  { %v61_v6 = vld [vmem:[%s60_s16] sm:$0x1]  ;;  %s65_s24 = scalar_lea.vmem %s4429_s1, %s2863_s22  ;;  %s3701_s0 = sld [smem:[#allocation5 + $0xb]]  ;;  %3164 = vmatprep.subr.mxu1 %v3568_v3  ;;  %v226_v1 = vld [vmem:[%s4430_s2 + $0x2] sm:$0x3] }
  0x18   :  { %63 = vst.msk [vmem:[#allocation2] sm:$0x1] %vm62_vm0, %v61_v6  ;;  %v66_v7 = vld [vmem:[%s65_s24] sm:$0x1]  ;;  %s69_s28 = scalar_lea.vmem %s4429_s1, %s3662_s23  ;;  %s3709_s30 = sld [smem:[#allocation5 + $0x4]]  ;;  %3165 = vmatpush3.msra.mxu1 %v3714_v8 }
  0x19   :  { %67 = vst.msk [vmem:[#allocation2 + $0x1] sm:$0x1] %vm62_vm0, %v66_v7  ;;  %v70_v9 = vld [vmem:[%s69_s28] sm:$0x1]  ;;  %s73_s19 = scalar_lea.vmem %s4429_s1, %s3670_s26  ;;  %s2871_s20 = sld [smem:[#allocation5 + $0xc]]  ;;  %3180 = vmatprep.subr.mxu1 %v3568_v3 }
  0x1a   :  { %71 = vst.msk [vmem:[#allocation2 + $0x2] sm:$0x1] %vm62_vm0, %v70_v9  ;;  %v74_v10 = vld [vmem:[%s73_s19] sm:$0x1]  ;;  %s77_s24 = scalar_lea.vmem %s4429_s1, %s3673_s4  ;;  %s2872_s25 = sld [smem:[#allocation5 + $0x5]] }
  0x1b   :  { %75 = vst.msk [vmem:[#allocation2 + $0x3] sm:$0x1] %vm62_vm0, %v74_v10  ;;  %v78_v11 = vld [vmem:[%s77_s24] sm:$0x1]  ;;  %s81_s28 = scalar_lea.vmem %s4429_s1, %s3681_s29  ;;  %s2873_s15 = sld [smem:[#allocation5 + $0xd]] }
  0x1c   :  { %79 = vst.msk [vmem:[#allocation2 + $0x4] sm:$0x1] %vm62_vm0, %v78_v11  ;;  %v82_v12 = vld [vmem:[%s81_s28] sm:$0x1]  ;;  %s85_s18 = scalar_lea.vmem %s4429_s1, %s3688_s17  ;;  %s2874_s4 = sld [smem:[#allocation5 + $0x6]] }
  0x1d   :  { %83 = vst.msk [vmem:[#allocation2 + $0x5] sm:$0x1] %vm62_vm0, %v82_v12  ;;  %v86_v13 = vld [vmem:[%s85_s18] sm:$0x1]  ;;  %s89_s21 = scalar_lea.vmem %s4429_s1, %s3701_s0  ;;  %s2875_s24 = sld [smem:[#allocation5 + $0xe]] }
  0x1e   :  { %87 = vst.msk [vmem:[#allocation2 + $0x6] sm:$0x1] %vm62_vm0, %v86_v13  ;;  %v90_v14 = vld [vmem:[%s89_s21] sm:$0x1]  ;;  %s93_s26 = scalar_lea.vmem %s4429_s1, %s3709_s30  ;;  %s2876_s28 = sld [smem:[#allocation5 + $0x7]] }
  0x1f   :  { %91 = vst.msk [vmem:[#allocation2 + $0x7] sm:$0x1] %vm62_vm0, %v90_v14  ;;  %v94_v15 = vld [vmem:[%s93_s26] sm:$0x1]  ;;  %s97_s22 = scalar_lea.vmem %s4429_s1, %s2871_s20  ;;  %s2877_s18 = sld [smem:[#allocation5 + $0xf]] }
  0x20   :  { %95 = vst.msk [vmem:[#allocation2 + $0x8] sm:$0x1] %vm62_vm0, %v94_v15  ;;  %v98_v16 = vld [vmem:[%s97_s22] sm:$0x1]  ;;  %s101_s23 = scalar_lea.vmem %s4429_s1, %s2872_s25 }
  0x21   :  { %99 = vst.msk [vmem:[#allocation2 + $0x9] sm:$0x1] %vm62_vm0, %v98_v16  ;;  %v102_v17 = vld [vmem:[%s101_s23] sm:$0x1]  ;;  %s105_s29 = scalar_lea.vmem %s4429_s1, %s2873_s15 }
  0x22   :  { %103 = vst.msk [vmem:[#allocation2 + $0xa] sm:$0x1] %vm62_vm0, %v102_v17  ;;  %v106_v18 = vld [vmem:[%s105_s29] sm:$0x1]  ;;  %s109_s26 = scalar_lea.vmem %s4429_s1, %s2874_s4  ;;  %s3572_s29 = smov 32  }
  0x23   :  { %107 = vst.msk [vmem:[#allocation2 + $0xb] sm:$0x1] %vm62_vm0, %v106_v18  ;;  %v110_v19 = vld [vmem:[%s109_s26] sm:$0x1]  ;;  %s113_s25 = scalar_lea.vmem %s4429_s1, %s2875_s24 }
  0x24   :  { %111 = vst.msk [vmem:[#allocation2 + $0xc] sm:$0x1] %vm62_vm0, %v110_v19  ;;  %v114_v20 = vld [vmem:[%s113_s25] sm:$0x1]  ;;  %s117_s0 = scalar_lea.vmem %s4429_s1, %s2876_s28 }
  0x25   :  { %115 = vst.msk [vmem:[#allocation2 + $0xd] sm:$0x1] %vm62_vm0, %v114_v20  ;;  %v118_v21 = vld [vmem:[%s117_s0] sm:$0x1]  ;;  %s121_s23 = scalar_lea.vmem %s4429_s1, %s2877_s18 }
  0x26   :  { %v124_v22 = vld [vmem:[#allocation2] sm:$0xff]  ;;  %119 = vst.msk [vmem:[#allocation2 + $0xe] sm:$0x1] %vm62_vm0, %v118_v21 }
  0x27   :  { %v122_v23 = vld [vmem:[%s121_s23] sm:$0x1]  ;;  %3111 = vmatprep.mubr.msk.f32.mxu0 %vm135_vm2, %v124_v22 }
  0x28   :  { %123 = vst.msk [vmem:[#allocation2 + $0xf] sm:$0x1] %vm62_vm0, %v122_v23  ;;  %v3901_v15 = vld [vmem:[%s4437_s9] ss:$0 sm:$0xff] }
  0x2f   :  { %v125_v24 = vld [vmem:[#allocation2 + $0x8] sm:$0xff] }
  0x30   :  { %3112 = vmatmul.mubr.msk.f32.vlgmr.msra.gmra.mxu0 %vm135_vm2, %v125_v24 }
  0x31   :  { %3115 = vmatpush3.msra.mxu0 %v3667_v2  ;;  %3122 = vmatprep.mubr.msk.f32.mxu0 %vm3569_vm1, %v3568_v3 }
  0x32   :  { %3116 = vmatprep.subr.mxu0 %v3568_v3 }
  0x33   :  { %3117 = vmatpush3.msra.mxu0 %v3678_v4 }
  0x34   :  { %3118 = vmatprep.subr.mxu0 %v3568_v3 }
  0x35   :  { %3119 = vmatpush3.msra.mxu0 %v3693_v5 }
  0x36   :  { %3120 = vmatprep.subr.mxu0 %v3568_v3 }
  0x37   :  { %3121 = vmatpush3.msra.mxu0 %v3714_v8 }
  0x38   :  { %3123 = vmatmul.mubr.msk.f32.vlgmr.msra.gmra.mxu0 %vm234_vm3, %v225_v25  ;;  %3125 = vmatprep.subr.mxu0 %v3568_v3 }
  0x39   :  { %3126 = vmatpush3.msra.mxu0 %v3667_v2  ;;  %3133 = vmatprep.mubr.msk.f32.mxu0 %vm3569_vm1, %v3568_v3 }
  0x3a   :  { %3127 = vmatprep.subr.mxu0 %v3568_v3 }
  0x3b   :  { %3128 = vmatpush3.msra.mxu0 %v3678_v4 }
  0x3c   :  { %3129 = vmatprep.subr.mxu0 %v3568_v3 }
  0x3d   :  { %3130 = vmatpush3.msra.mxu0 %v3693_v5 }
  0x3e   :  { %3131 = vmatprep.subr.mxu0 %v3568_v3 }
  0x3f   :  { %3132 = vmatpush3.msra.mxu0 %v3714_v8 }
  0x40   :  { %3136 = vmatprep.subr.mxu0 %v3568_v3 }
  0xf0   :  { %v3113_v28 = vpop.f32.mrf.mxu0 }
  0xf1   :  { %v214_v29 = vadd.f32 %v3113_v28, %v2878_v26 }
  0xf2   :  { %v208_v30 = vpop.f32.mrf.mxu0 }
  0xf3   :  { %218 = vst [vmem:[#allocation3 + $0x8] sm:$0xff] %v214_v29  ;;  %v209_v32 = vadd.f32 %v2878_v26, %v208_v30 }
  0xf5   :  { %217 = vst [vmem:[#allocation3] sm:$0xff] %v209_v32 }
  0xf8   :  { %v304_v33 = vpop.f32.mrf.mxu0 }
  0xfa   :  { %v3124_v34 = vpop.f32.mrf.mxu0 }
  0xfc   :  { %v229_v37 = vld [vmem:[#allocation3] sm:$0x3]  ;;  %v339_v6 = vld [vmem:[#allocation3 + $0x2] sm:$0x3] }
  0xfd   :  { %v308_v38 = vadd.f32 %v304_v33, %v229_v37  ;;  %v228_v33 = vld [vmem:[%s4431_s3 + $0x2] sm:$0x3] }
  0xff   :  { %v309_v39 = vmul.f32 %v308_v38, %v3807_v36 }
 0x101   :  { %v2882_v40 = vmul.f32 -1.442695, %v309_v39 }
 0x103   :  { %3389 = vpow2.f32 %v2882_v40 }
 0x110   :  { %v3390_v41 = vpop.eup %3389 }
 0x111   :  { %v313_v42 = vadd.f32 1.0, %v3390_v41 }
 0x113   :  { %3391 = vrcp.f32 %v313_v42 }
 0x120   :  { %v3392_v43 = vpop.eup %3391 }
 0x121   :  { %v316_v44 = vmul.f32 2.0, %v3392_v43 }
 0x123   :  { %v2883_v45 = vadd.f32 -1.0, %v316_v44 }
 0x125   :  { %324 = vrot.lane.b32.xlu0 %v2883_v45, %s3571_s6 }
 0x129   :  { %319 = vrot.lane.b32.xlu0 %v227_v46, %s3572_s29 }
 0x197   :  { %v325_v47 = vpop.permute.xlu0 %324 }
 0x198   :  { %v327_v48 = vmul.f32 %v3392_v43, %v325_v47 }
 0x19a   :  { %329 = vrot.lane.b32.xlu1 %v327_v48, %s3572_s29 }
 0x19b   :  { %v320_v49 = vpop.permute.xlu0 %319 }
 0x19c   :  { %v322_v50 = vmul.f32 %v3392_v43, %v320_v49 }
 0x20c   :  { %v330_v51 = vpop.permute.xlu1 %329 }
 0x20d   :  { %v3816_v52 = vadd.f32 %v330_v51, %v322_v50 }
 0x20f   :  { %3393 = vtanh.f32 %v3816_v52 }
 0x21c   :  { %v3394_v53 = vpop.eup %3393 }
 0x21d   :  { %335 = vrot.lane.b32.xlu1 %v3394_v53, %s3571_s6 }
 0x28f   :  { %v336_v54 = vpop.permute.xlu1 %335 }
 0x290   :  { %v338_v55 = vmul.f32 %v3392_v43, %v336_v54  ;;  %v644_v54 = vld [vmem:[#allocation3 + $0x4] sm:$0x3] }
 0x292   :  { %341 = vrot.lane.b32.xlu0 %v338_v55, %s3572_s29 }
 0x304   :  { %v342_v57 = vpop.permute.xlu0 %341 }
 0x305   :  { %3134 = vmatmul.mubr.msk.f32.vlgmr.msra.gmra.mxu0 %vm234_vm3, %v342_v57 }
 0x306   :  { %3137 = vmatpush3.msra.mxu0 %v3824_v56  ;;  %3144 = vmatprep.mubr.msk.f32.mxu0 %vm3569_vm1, %v3568_v3 }
 0x307   :  { %3138 = vmatprep.subr.mxu0 %v3568_v3 }
 0x308   :  { %3139 = vmatpush3.msra.mxu0 %v3830_v58 }
 0x309   :  { %3140 = vmatprep.subr.mxu0 %v3568_v3 }
 0x30a   :  { %3141 = vmatpush3.msra.mxu0 %v3839_v59 }
 0x30b   :  { %3142 = vmatprep.subr.mxu0 %v3568_v3 }
 0x30c   :  { %3143 = vmatpush3.msra.mxu0 %v3846_v60 }
 0x30d   :  { %3145 = vmatmul.mubr.msk.f32.vlgmr.msra.gmra.mxu0 %vm234_vm3, %v342_v57  ;;  %3147 = vmatprep.subr.mxu0 %v3568_v3 }
 0x30e   :  { %3148 = vmatpush3.msra.mxu0 %v3853_v61  ;;  %3155 = vmatprep.mubr.msk.f32.mxu0 %vm3569_vm1, %v3568_v3 }
 0x30f   :  { %3149 = vmatprep.subr.mxu0 %v3568_v3 }
 0x310   :  { %3150 = vmatpush3.msra.mxu0 %v3861_v62 }
 0x311   :  { %3151 = vmatprep.subr.mxu0 %v3568_v3 }
 0x312   :  { %3152 = vmatpush3.msra.mxu0 %v3870_v63 }
 0x313   :  { %3153 = vmatprep.subr.mxu0 %v3568_v3 }
 0x314   :  { %3154 = vmatpush3.msra.mxu0 %v3877_v0 }
 0x315   :  { %3156 = vmatmul.mubr.msk.f32.vlgmr.msra.gmra.mxu0 %vm234_vm3, %v226_v1  ;;  %3169 = vmatprep.subr.mxu0 %v3568_v3 }
 0x316   :  { %3170 = vmatpush3.msra.mxu0 %v3824_v56  ;;  %3177 = vmatprep.mubr.msk.f32.mxu0 %vm3569_vm1, %v3568_v3 }
 0x317   :  { %3171 = vmatprep.subr.mxu0 %v3568_v3 }
 0x318   :  { %3172 = vmatpush3.msra.mxu0 %v3830_v58 }
 0x319   :  { %3173 = vmatprep.subr.mxu0 %v3568_v3 }
 0x31a   :  { %3174 = vmatpush3.msra.mxu0 %v3839_v59 }
 0x31b   :  { %3175 = vmatprep.subr.mxu0 %v3568_v3 }
 0x31c   :  { %3176 = vmatpush3.msra.mxu0 %v3846_v60 }
 0x31d   :  { %3191 = vmatprep.subr.mxu0 %v3568_v3 }
 0x3c5   :  { %v411_v7 = vpop.f32.mrf.mxu0 }
 0x3c6   :  { %v415_v9 = vadd.f32 %v411_v7, %v339_v6 }
 0x3c7   :  { %v3135_v10 = vpop.f32.mrf.mxu0 }
 0x3c8   :  { %v416_v11 = vmul.f32 %v415_v9, %v3807_v36 }
 0x3ca   :  { %v2885_v12 = vmul.f32 -1.442695, %v416_v11 }
 0x3cc   :  { %3395 = vpow2.f32 %v2885_v12 }
 0x3cd   :  { %v519_v13 = vpop.f32.mrf.mxu0 }
 0x3ce   :  { %v520_v16 = vadd.f32 %v3901_v15, %v519_v13 }
 0x3cf   :  { %v3146_v14 = vpop.f32.mrf.mxu0 }
 0x3d5   :  { %v596_v17 = vpop.f32.mrf.mxu0 }
 0x3d6   :  { %v600_v18 = vadd.f32 %v596_v17, %v520_v16 }
 0x3d7   :  { %v3157_v19 = vpop.f32.mrf.mxu0 }
 0x3d8   :  { %v601_v20 = vmul.f32 %v600_v18, %v3807_v36 }
 0x3d9   :  { %v3396_v21 = vpop.eup %3395 }
 0x3da   :  { %v420_v22 = vadd.f32 1.0, %v3396_v21  ;;  %v2890_v23 = vmul.f32 -1.442695, %v601_v20 }
 0x3dc   :  { %3397 = vrcp.f32 %v420_v22 }
 0x3dd   :  { %3399 = vpow2.f32 %v2890_v23 }
 0x3e9   :  { %v3398_v24 = vpop.eup %3397 }
 0x3ea   :  { %v3400_v25 = vpop.eup %3399  ;;  %v423_v26 = vmul.f32 2.0, %v3398_v24  ;;  %v425_v39 = vmul.f32 %v3398_v24, %v3816_v52 }
 0x3eb   :  { %v605_v28 = vadd.f32 1.0, %v3400_v25 }
 0x3ec   :  { %v2886_v29 = vadd.f32 -1.0, %v423_v26 }
 0x3ed   :  { %3401 = vrcp.f32 %v605_v28 }
 0x3ee   :  { %427 = vrot.lane.b32.xlu1 %v2886_v29, %s3571_s6 }
 0x3fa   :  { %v3402_v30 = vpop.eup %3401 }
 0x3fb   :  { %v608_v31 = vmul.f32 2.0, %v3402_v30 }
 0x3fd   :  { %v2891_v32 = vadd.f32 -1.0, %v608_v31 }
 0x3ff   :  { %616 = vrot.lane.b32.xlu0 %v2891_v32, %s3571_s6 }
 0x403   :  { %611 = vrot.lane.b32.xlu0 %v228_v33, %s3572_s29 }
 0x460   :  { %v428_v34 = vpop.permute.xlu1 %427 }
 0x461   :  { %v430_v35 = vmul.f32 %v3398_v24, %v428_v34 }
 0x463   :  { %432 = vrot.lane.b32.xlu1 %v430_v35, %s3572_s29 }
 0x471   :  { %v617_v37 = vpop.permute.xlu0 %616 }
 0x472   :  { %v619_v38 = vmul.f32 %v3402_v30, %v617_v37 }
 0x474   :  { %621 = vrot.lane.b32.xlu1 %v619_v38, %s3572_s29 }
 0x475   :  { %v612_v42 = vpop.permute.xlu0 %611 }
 0x476   :  { %v614_v44 = vmul.f32 %v3402_v30, %v612_v42 }
 0x4d5   :  { %v433_v40 = vpop.permute.xlu1 %432 }
 0x4d6   :  { %v3914_v41 = vadd.f32 %v433_v40, %v425_v39 }
 0x4d8   :  { %3403 = vtanh.f32 %v3914_v41 }
 0x4e5   :  { %v3404_v43 = vpop.eup %3403 }
 0x4e6   :  { %v622_v45 = vpop.permute.xlu1 %621  ;;  %438 = vrot.lane.b32.xlu0 %v3404_v43, %s3571_s6 }
 0x4e7   :  { %v3918_v46 = vadd.f32 %v622_v45, %v614_v44 }
 0x4e9   :  { %3405 = vtanh.f32 %v3918_v46 }
 0x4f6   :  { %v3406_v47 = vpop.eup %3405 }
 0x4f7   :  { %627 = vrot.lane.b32.xlu1 %v3406_v47, %s3571_s6 }
 0x558   :  { %v439_v48 = vpop.permute.xlu0 %438 }
 0x559   :  { %v441_v49 = vmul.f32 %v3398_v24, %v439_v48  ;;  %v950_v48 = vld [vmem:[#allocation3 + $0x6] sm:$0x3] }
 0x55b   :  { %650 = vrot.lane.b32.xlu0 %v441_v49, %s3572_s29 }
 0x569   :  { %v628_v50 = vpop.permute.xlu1 %627 }
 0x56a   :  { %v3923_v51 = vmul.f32 %v3402_v30, %v628_v50 }
 0x56c   :  { %836 = vrot.lane.b32.xlu1 %v3923_v51, %s3572_s29 }
 0x5cd   :  { %v651_v52 = vpop.permute.xlu0 %650 }
 0x5ce   :  { %3167 = vmatmul.mubr.msk.f32.vlgmr.msra.gmra.mxu1 %vm234_vm3, %v651_v52  ;;  %3178 = vmatmul.mubr.msk.f32.vlgmr.msra.gmra.mxu0 %vm234_vm3, %v651_v52 }
 0x5cf   :  { %3181 = vmatpush3.msra.mxu1 %v3853_v61  ;;  %3188 = vmatprep.mubr.msk.f32.mxu1 %vm3569_vm1, %v3568_v3 }
 0x5d0   :  { %3182 = vmatprep.subr.mxu1 %v3568_v3  ;;  %3192 = vmatpush3.msra.mxu0 %v3667_v2 }
 0x5d1   :  { %3183 = vmatpush3.msra.mxu1 %v3861_v62  ;;  %3193 = vmatprep.subr.mxu0 %v3568_v3 }
 0x5d2   :  { %3184 = vmatprep.subr.mxu1 %v3568_v3  ;;  %3194 = vmatpush3.msra.mxu0 %v3678_v4 }
 0x5d3   :  { %3185 = vmatpush3.msra.mxu1 %v3870_v63  ;;  %3195 = vmatprep.subr.mxu0 %v3568_v3 }
 0x5d4   :  { %3186 = vmatprep.subr.mxu1 %v3568_v3  ;;  %3196 = vmatpush3.msra.mxu0 %v3693_v5 }
 0x5d5   :  { %3187 = vmatpush3.msra.mxu1 %v3877_v0  ;;  %3197 = vmatprep.subr.mxu0 %v3568_v3 }
 0x5d6   :  { %3202 = vmatprep.subr.mxu1 %v3568_v3  ;;  %3198 = vmatpush3.msra.mxu0 %v3714_v8 }
 0x5d7   :  { %3199 = vmatprep.mubr.msk.f32.mxu0 %vm3569_vm1, %v3568_v3  ;;  %3213 = vmatprep.subr.mxu0 %v3568_v3 }
 0x5de   :  { %v837_v53 = vpop.permute.xlu1 %836 }
 0x5df   :  { %3189 = vmatmul.mubr.msk.f32.vlgmr.msra.gmra.mxu1 %vm234_vm3, %v837_v53 }
 0x5e0   :  { %3203 = vmatpush3.msra.mxu1 %v3824_v56  ;;  %3210 = vmatprep.mubr.msk.f32.mxu1 %vm3569_vm1, %v3568_v3 }
 0x5e1   :  { %3204 = vmatprep.subr.mxu1 %v3568_v3 }
 0x5e2   :  { %3205 = vmatpush3.msra.mxu1 %v3830_v58 }
 0x5e3   :  { %3206 = vmatprep.subr.mxu1 %v3568_v3 }
 0x5e4   :  { %3207 = vmatpush3.msra.mxu1 %v3839_v59 }
 0x5e5   :  { %3208 = vmatprep.subr.mxu1 %v3568_v3 }
 0x5e6   :  { %3209 = vmatpush3.msra.mxu1 %v3846_v60 }
 0x5e7   :  { %3224 = vmatprep.subr.mxu1 %v3568_v3 }
 0x68e   :  { %v720_v55 = vpop.f32.mrf.mxu1  ;;  %v828_v57 = vpop.f32.mrf.mxu0 }
 0x68f   :  { %v724_v1 = vadd.f32 %v720_v55, %v644_v54  ;;  %v829_v11 = vadd.f32 %v3901_v15, %v828_v57 }
 0x690   :  { %v3168_v6 = vpop.f32.mrf.mxu1  ;;  %v3179_v7 = vpop.f32.mrf.mxu0 }
 0x691   :  { %v725_v9 = vmul.f32 %v724_v1, %v3807_v36 }
 0x693   :  { %v2893_v10 = vmul.f32 -1.442695, %v725_v9 }
 0x695   :  { %3407 = vpow2.f32 %v2893_v10 }
 0x69f   :  { %v906_v12 = vpop.f32.mrf.mxu1 }
 0x6a0   :  { %v910_v13 = vadd.f32 %v906_v12, %v829_v11 }
 0x6a1   :  { %v3190_v14 = vpop.f32.mrf.mxu1 }
 0x6a2   :  { %v3408_v16 = vpop.eup %3407  ;;  %v911_v17 = vmul.f32 %v910_v13, %v3807_v36 }
 0x6a3   :  { %v729_v18 = vadd.f32 1.0, %v3408_v16 }
 0x6a4   :  { %v2898_v19 = vmul.f32 -1.442695, %v911_v17 }
 0x6a5   :  { %3409 = vrcp.f32 %v729_v18 }
 0x6a6   :  { %3411 = vpow2.f32 %v2898_v19 }
 0x6b2   :  { %v3410_v20 = vpop.eup %3409 }
 0x6b3   :  { %v3412_v21 = vpop.eup %3411  ;;  %v732_v22 = vmul.f32 2.0, %v3410_v20  ;;  %v734_v33 = vmul.f32 %v3410_v20, %v3914_v41 }
 0x6b4   :  { %v915_v23 = vadd.f32 1.0, %v3412_v21 }
 0x6b5   :  { %v2894_v24 = vadd.f32 -1.0, %v732_v22 }
 0x6b6   :  { %3413 = vrcp.f32 %v915_v23 }
 0x6b7   :  { %736 = vrot.lane.b32.xlu0 %v2894_v24, %s3571_s6 }
 0x6c3   :  { %v3414_v25 = vpop.eup %3413 }
 0x6c4   :  { %v918_v26 = vmul.f32 2.0, %v3414_v25  ;;  %v920_v38 = vmul.f32 %v3414_v25, %v3918_v46 }
 0x6c6   :  { %v2899_v28 = vadd.f32 -1.0, %v918_v26 }
 0x6c8   :  { %922 = vrot.lane.b32.xlu1 %v2899_v28, %s3571_s6 }
 0x729   :  { %v737_v29 = vpop.permute.xlu0 %736 }
 0x72a   :  { %v739_v30 = vmul.f32 %v3410_v20, %v737_v29 }
 0x72c   :  { %741 = vrot.lane.b32.xlu0 %v739_v30, %s3572_s29 }
 0x73a   :  { %v923_v31 = vpop.permute.xlu1 %922 }
 0x73b   :  { %v925_v32 = vmul.f32 %v3414_v25, %v923_v31 }
 0x73d   :  { %927 = vrot.lane.b32.xlu1 %v925_v32, %s3572_s29 }
 0x79e   :  { %v742_v34 = vpop.permute.xlu0 %741 }
 0x79f   :  { %v3968_v35 = vadd.f32 %v742_v34, %v734_v33 }
 0x7a1   :  { %3415 = vtanh.f32 %v3968_v35 }
 0x7ae   :  { %v3416_v37 = vpop.eup %3415 }
 0x7af   :  { %v928_v39 = vpop.permute.xlu1 %927  ;;  %747 = vrot.lane.b32.xlu0 %v3416_v37, %s3571_s6 }
 0x7b0   :  { %v3973_v40 = vadd.f32 %v928_v39, %v920_v38 }
 0x7b2   :  { %3417 = vtanh.f32 %v3973_v40 }
 0x7bf   :  { %v3418_v42 = vpop.eup %3417 }
 0x7c0   :  { %933 = vrot.lane.b32.xlu1 %v3418_v42, %s3571_s6 }
 0x821   :  { %v748_v43 = vpop.permute.xlu0 %747 }
 0x822   :  { %v750_v41 = vmul.f32 %v3410_v20, %v748_v43 }
 0x824   :  { %956 = vrot.lane.b32.xlu0 %v750_v41, %s3572_s29 }
 0x832   :  { %v934_v44 = vpop.permute.xlu1 %933 }
 0x833   :  { %v3978_v45 = vmul.f32 %v3414_v25, %v934_v44 }
 0x835   :  { %1142 = vrot.lane.b32.xlu1 %v3978_v45, %s3572_s29 }
 0x896   :  { %v957_v46 = vpop.permute.xlu0 %956 }
 0x897   :  { %3200 = vmatmul.mubr.msk.f32.vlgmr.msra.gmra.mxu0 %vm234_vm3, %v957_v46  ;;  %3211 = vmatmul.mubr.msk.f32.vlgmr.msra.gmra.mxu1 %vm234_vm3, %v957_v46 }
 0x898   :  { %3214 = vmatpush3.msra.mxu0 %v3853_v61  ;;  %3221 = vmatprep.mubr.msk.f32.mxu0 %vm3569_vm1, %v3568_v3 }
 0x899   :  { %3215 = vmatprep.subr.mxu0 %v3568_v3  ;;  %3225 = vmatpush3.msra.mxu1 %v3667_v2 }
 0x89a   :  { %3216 = vmatpush3.msra.mxu0 %v3861_v62  ;;  %3226 = vmatprep.subr.mxu1 %v3568_v3 }
 0x89b   :  { %3217 = vmatprep.subr.mxu0 %v3568_v3  ;;  %3227 = vmatpush3.msra.mxu1 %v3678_v4 }
 0x89c   :  { %3218 = vmatpush3.msra.mxu0 %v3870_v63  ;;  %3228 = vmatprep.subr.mxu1 %v3568_v3 }
 0x89d   :  { %3219 = vmatprep.subr.mxu0 %v3568_v3  ;;  %3229 = vmatpush3.msra.mxu1 %v3693_v5 }
 0x89e   :  { %3220 = vmatpush3.msra.mxu0 %v3877_v0  ;;  %3230 = vmatprep.subr.mxu1 %v3568_v3 }
 0x89f   :  { %3235 = vmatprep.subr.mxu0 %v3568_v3  ;;  %3231 = vmatpush3.msra.mxu1 %v3714_v8 }
 0x8a0   :  { %3232 = vmatprep.mubr.msk.f32.mxu1 %vm3569_vm1, %v3568_v3  ;;  %3246 = vmatprep.subr.mxu1 %v3568_v3 }
 0x8a7   :  { %v1143_v47 = vpop.permute.xlu1 %1142 }
 0x8a8   :  { %3222 = vmatmul.mubr.msk.f32.vlgmr.msra.gmra.mxu0 %vm234_vm3, %v1143_v47 }
 0x8a9   :  { %3236 = vmatpush3.msra.mxu0 %v3824_v56  ;;  %3243 = vmatprep.mubr.msk.f32.mxu0 %vm3569_vm1, %v3568_v3 }
 0x8aa   :  { %3237 = vmatprep.subr.mxu0 %v3568_v3 }
 0x8ab   :  { %3238 = vmatpush3.msra.mxu0 %v3830_v58 }
 0x8ac   :  { %3239 = vmatprep.subr.mxu0 %v3568_v3 }
 0x8ad   :  { %3240 = vmatpush3.msra.mxu0 %v3839_v59 }
 0x8ae   :  { %3241 = vmatprep.subr.mxu0 %v3568_v3 }
 0x8af   :  { %3242 = vmatpush3.msra.mxu0 %v3846_v60 }
 0x8b0   :  { %3257 = vmatprep.subr.mxu0 %v3568_v3 }
 0x957   :  { %v1026_v49 = vpop.f32.mrf.mxu0  ;;  %v1134_v50 = vpop.f32.mrf.mxu1 }
 0x958   :  { %v1030_v52 = vadd.f32 %v1026_v49, %v950_v48  ;;  %v1135_v1 = vadd.f32 %v3901_v15, %v1134_v50 }
 0x959   :  { %v3201_v53 = vpop.f32.mrf.mxu0  ;;  %v3212_v54 = vpop.f32.mrf.mxu1 }
 0x95a   :  { %v1031_v55 = vmul.f32 %v1030_v52, %v3807_v36 }
 0x95c   :  { %v2901_v57 = vmul.f32 -1.442695, %v1031_v55 }
 0x95e   :  { %3419 = vpow2.f32 %v2901_v57 }
 0x968   :  { %v1212_v6 = vpop.f32.mrf.mxu0 }
 0x969   :  { %v1216_v7 = vadd.f32 %v1212_v6, %v1135_v1 }
 0x96a   :  { %v3223_v9 = vpop.f32.mrf.mxu0 }
 0x96b   :  { %v3420_v10 = vpop.eup %3419  ;;  %v1217_v11 = vmul.f32 %v1216_v7, %v3807_v36 }
 0x96c   :  { %v1035_v12 = vadd.f32 1.0, %v3420_v10 }
 0x96d   :  { %v2906_v13 = vmul.f32 -1.442695, %v1217_v11 }
 0x96e   :  { %3421 = vrcp.f32 %v1035_v12 }
 0x96f   :  { %3423 = vpow2.f32 %v2906_v13 }
 0x97b   :  { %v3422_v14 = vpop.eup %3421 }
 0x97c   :  { %v3424_v16 = vpop.eup %3423  ;;  %v1038_v17 = vmul.f32 2.0, %v3422_v14  ;;  %v1040_v28 = vmul.f32 %v3422_v14, %v3968_v35 }
 0x97d   :  { %v1221_v18 = vadd.f32 1.0, %v3424_v16 }
 0x97e   :  { %v2902_v19 = vadd.f32 -1.0, %v1038_v17 }
 0x97f   :  { %3425 = vrcp.f32 %v1221_v18 }
 0x980   :  { %1042 = vrot.lane.b32.xlu0 %v2902_v19, %s3571_s6 }
 0x98c   :  { %v3426_v20 = vpop.eup %3425 }
 0x98d   :  { %v1224_v21 = vmul.f32 2.0, %v3426_v20  ;;  %v1226_v32 = vmul.f32 %v3426_v20, %v3973_v40 }
 0x98f   :  { %v2907_v22 = vadd.f32 -1.0, %v1224_v21 }
 0x991   :  { %1228 = vrot.lane.b32.xlu1 %v2907_v22, %s3571_s6 }
 0x9f2   :  { %v1043_v23 = vpop.permute.xlu0 %1042 }
 0x9f3   :  { %v1045_v24 = vmul.f32 %v3422_v14, %v1043_v23 }
 0x9f5   :  { %1047 = vrot.lane.b32.xlu0 %v1045_v24, %s3572_s29 }
 0xa03   :  { %v1229_v25 = vpop.permute.xlu1 %1228 }
 0xa04   :  { %v1231_v26 = vmul.f32 %v3426_v20, %v1229_v25 }
 0xa06   :  { %1233 = vrot.lane.b32.xlu1 %v1231_v26, %s3572_s29 }
 0xa67   :  { %v1048_v29 = vpop.permute.xlu0 %1047 }
 0xa68   :  { %v4023_v30 = vadd.f32 %v1048_v29, %v1040_v28 }
 0xa6a   :  { %3427 = vtanh.f32 %v4023_v30 }
 0xa77   :  { %v3428_v31 = vpop.eup %3427 }
 0xa78   :  { %v1234_v33 = vpop.permute.xlu1 %1233  ;;  %1053 = vrot.lane.b32.xlu0 %v3428_v31, %s3571_s6 }
 0xa79   :  { %v4028_v34 = vadd.f32 %v1234_v33, %v1226_v32 }
 0xa7b   :  { %3429 = vtanh.f32 %v4028_v34 }
 0xa88   :  { %v3430_v37 = vpop.eup %3429 }
 0xa89   :  { %1239 = vrot.lane.b32.xlu1 %v3430_v37, %s3571_s6 }
 0xaea   :  { %v1054_v38 = vpop.permute.xlu0 %1053 }
 0xaeb   :  { %v1056_v35 = vmul.f32 %v3422_v14, %v1054_v38 }
 0xaed   :  { %1262 = vrot.lane.b32.xlu0 %v1056_v35, %s3572_s29 }
 0xafb   :  { %v1240_v39 = vpop.permute.xlu1 %1239 }
 0xafc   :  { %v4033_v42 = vmul.f32 %v3426_v20, %v1240_v39 }
 0xafe   :  { %1448 = vrot.lane.b32.xlu1 %v4033_v42, %s3572_s29 }
 0xb5f   :  { %v1263_v40 = vpop.permute.xlu0 %1262 }
 0xb60   :  { %3233 = vmatmul.mubr.msk.f32.vlgmr.msra.gmra.mxu1 %vm234_vm3, %v1263_v40  ;;  %3244 = vmatmul.mubr.msk.f32.vlgmr.msra.gmra.mxu0 %vm234_vm3, %v1263_v40 }
 0xb61   :  { %3247 = vmatpush3.msra.mxu1 %v3853_v61  ;;  %3254 = vmatprep.mubr.msk.f32.mxu1 %vm3569_vm1, %v3568_v3 }
 0xb62   :  { %3248 = vmatprep.subr.mxu1 %v3568_v3  ;;  %3258 = vmatpush3.msra.mxu0 %v3667_v2 }
 0xb63   :  { %3249 = vmatpush3.msra.mxu1 %v3861_v62  ;;  %3259 = vmatprep.subr.mxu0 %v3568_v3 }
 0xb64   :  { %3250 = vmatprep.subr.mxu1 %v3568_v3  ;;  %3260 = vmatpush3.msra.mxu0 %v3678_v4  ;;  %v1256_v4 = vld [vmem:[#allocation3 + $0x8] sm:$0x3] }
 0xb65   :  { %3251 = vmatpush3.msra.mxu1 %v3870_v63  ;;  %3261 = vmatprep.subr.mxu0 %v3568_v3 }
 0xb66   :  { %3252 = vmatprep.subr.mxu1 %v3568_v3  ;;  %3262 = vmatpush3.msra.mxu0 %v3693_v5 }
 0xb67   :  { %3253 = vmatpush3.msra.mxu1 %v3877_v0  ;;  %3263 = vmatprep.subr.mxu0 %v3568_v3 }
 0xb68   :  { %3268 = vmatprep.subr.mxu1 %v3568_v3  ;;  %3264 = vmatpush3.msra.mxu0 %v3714_v8 }
 0xb69   :  { %3265 = vmatprep.mubr.msk.f32.mxu0 %vm3569_vm1, %v3568_v3  ;;  %3279 = vmatprep.subr.mxu0 %v3568_v3 }
 0xb70   :  { %v1449_v2 = vpop.permute.xlu1 %1448 }
 0xb71   :  { %3255 = vmatmul.mubr.msk.f32.vlgmr.msra.gmra.mxu1 %vm234_vm3, %v1449_v2 }
 0xb72   :  { %3269 = vmatpush3.msra.mxu1 %v3824_v56  ;;  %3276 = vmatprep.mubr.msk.f32.mxu1 %vm3569_vm1, %v3568_v3 }
 0xb73   :  { %3270 = vmatprep.subr.mxu1 %v3568_v3 }
 0xb74   :  { %3271 = vmatpush3.msra.mxu1 %v3830_v58 }
 0xb75   :  { %3272 = vmatprep.subr.mxu1 %v3568_v3 }
 0xb76   :  { %3273 = vmatpush3.msra.mxu1 %v3839_v59 }
 0xb77   :  { %3274 = vmatprep.subr.mxu1 %v3568_v3 }
 0xb78   :  { %3275 = vmatpush3.msra.mxu1 %v3846_v60 }
 0xb79   :  { %3290 = vmatprep.subr.mxu1 %v3568_v3 }
 0xc20   :  { %v1332_v5 = vpop.f32.mrf.mxu1  ;;  %v1440_v8 = vpop.f32.mrf.mxu0 }
 0xc21   :  { %v1336_v43 = vadd.f32 %v1332_v5, %v1256_v4  ;;  %v1441_v48 = vadd.f32 %v3901_v15, %v1440_v8 }
 0xc22   :  { %v3234_v41 = vpop.f32.mrf.mxu1  ;;  %v3245_v44 = vpop.f32.mrf.mxu0 }
 0xc23   :  { %v1337_v46 = vmul.f32 %v1336_v43, %v3807_v36 }
 0xc25   :  { %v2909_v47 = vmul.f32 -1.442695, %v1337_v46 }
 0xc27   :  { %3431 = vpow2.f32 %v2909_v47 }
 0xc31   :  { %v1518_v49 = vpop.f32.mrf.mxu1 }
 0xc32   :  { %v1522_v50 = vadd.f32 %v1518_v49, %v1441_v48 }
 0xc33   :  { %v3256_v52 = vpop.f32.mrf.mxu1 }
 0xc34   :  { %v3432_v53 = vpop.eup %3431  ;;  %v1523_v54 = vmul.f32 %v1522_v50, %v3807_v36 }
 0xc35   :  { %v1341_v55 = vadd.f32 1.0, %v3432_v53 }
 0xc36   :  { %v2914_v57 = vmul.f32 -1.442695, %v1523_v54 }
 0xc37   :  { %3433 = vrcp.f32 %v1341_v55 }
 0xc38   :  { %3435 = vpow2.f32 %v2914_v57 }
 0xc44   :  { %v3434_v1 = vpop.eup %3433 }
 0xc45   :  { %v3436_v6 = vpop.eup %3435  ;;  %v1344_v7 = vmul.f32 2.0, %v3434_v1  ;;  %v1346_v19 = vmul.f32 %v3434_v1, %v4023_v30 }
 0xc46   :  { %v1527_v9 = vadd.f32 1.0, %v3436_v6 }
 0xc47   :  { %v2910_v10 = vadd.f32 -1.0, %v1344_v7 }
 0xc48   :  { %3437 = vrcp.f32 %v1527_v9 }
 0xc49   :  { %1348 = vrot.lane.b32.xlu0 %v2910_v10, %s3571_s6 }
 0xc55   :  { %v3438_v11 = vpop.eup %3437 }
 0xc56   :  { %v1530_v12 = vmul.f32 2.0, %v3438_v11  ;;  %v1532_v23 = vmul.f32 %v3438_v11, %v4028_v34  ;;  %v1551_v34 = vld [vmem:[#allocation3 + $0xa] sm:$0x3] }
 0xc58   :  { %v2915_v13 = vadd.f32 -1.0, %v1530_v12 }
 0xc5a   :  { %1534 = vrot.lane.b32.xlu1 %v2915_v13, %s3571_s6 }
 0xcbb   :  { %v1349_v14 = vpop.permute.xlu0 %1348 }
 0xcbc   :  { %v1351_v16 = vmul.f32 %v3434_v1, %v1349_v14  ;;  %v1861_v14 = vld [vmem:[%s4433_s5 + $0x18] sm:$0xff] }
 0xcbe   :  { %1353 = vrot.lane.b32.xlu0 %v1351_v16, %s3572_s29  ;;  %v1860_v16 = vld [vmem:[%s4433_s5 + $0x10] sm:$0xff] }
 0xccc   :  { %v1535_v17 = vpop.permute.xlu1 %1534 }
 0xccd   :  { %v1537_v18 = vmul.f32 %v3438_v11, %v1535_v17  ;;  %v1859_v17 = vld [vmem:[%s4433_s5 + $0x8] sm:$0xff] }
 0xccf   :  { %1539 = vrot.lane.b32.xlu1 %v1537_v18, %s3572_s29  ;;  %v1858_v18 = vld [vmem:[%s4433_s5] sm:$0xff]  ;;  %s3574_s5 = smov 96  }
 0xd30   :  { %v1354_v20 = vpop.permute.xlu0 %1353 }
 0xd31   :  { %v4078_v21 = vadd.f32 %v1354_v20, %v1346_v19 }
 0xd33   :  { %3439 = vtanh.f32 %v4078_v21 }
 0xd40   :  { %v3440_v22 = vpop.eup %3439 }
 0xd41   :  { %v1540_v24 = vpop.permute.xlu1 %1539  ;;  %1359 = vrot.lane.b32.xlu0 %v3440_v22, %s3571_s6 }
 0xd42   :  { %v4083_v25 = vadd.f32 %v1540_v24, %v1532_v23 }
 0xd44   :  { %3441 = vtanh.f32 %v4083_v25 }
 0xd51   :  { %v3442_v26 = vpop.eup %3441 }
 0xd52   :  { %1545 = vrot.lane.b32.xlu1 %v3442_v26, %s3571_s6 }
 0xdb3   :  { %v1360_v28 = vpop.permute.xlu0 %1359 }
 0xdb4   :  { %v1362_v29 = vmul.f32 %v3434_v1, %v1360_v28 }
 0xdb6   :  { %1557 = vrot.lane.b32.xlu0 %v1362_v29, %s3572_s29 }
 0xdc4   :  { %v1546_v30 = vpop.permute.xlu1 %1545 }
 0xdc5   :  { %v4088_v31 = vmul.f32 %v3438_v11, %v1546_v30 }
 0xdc7   :  { %1744 = vrot.lane.b32.xlu1 %v4088_v31, %s3572_s29 }
 0xe28   :  { %v1558_v32 = vpop.permute.xlu0 %1557 }
 0xe29   :  { %3266 = vmatmul.mubr.msk.f32.vlgmr.msra.gmra.mxu0 %vm234_vm3, %v1558_v32  ;;  %3277 = vmatmul.mubr.msk.f32.vlgmr.msra.gmra.mxu1 %vm234_vm3, %v1558_v32 }
 0xe2a   :  { %3280 = vmatpush3.msra.mxu0 %v3853_v61  ;;  %3287 = vmatprep.mubr.msk.f32.mxu0 %vm3569_vm1, %v3568_v3 }
 0xe2b   :  { %3281 = vmatprep.subr.mxu0 %v3568_v3  ;;  %3298 = vmatprep.mubr.msk.f32.mxu1 %vm3569_vm1, %v3568_v3 }
 0xe2c   :  { %3282 = vmatpush3.msra.mxu0 %v3861_v62  ;;  %3291 = vmatpush3.msra.mxu1 %v1861_v14 }
 0xe2d   :  { %3283 = vmatprep.subr.mxu0 %v3568_v3  ;;  %3292 = vmatprep.subr.mxu1 %v3568_v3 }
 0xe2e   :  { %3284 = vmatpush3.msra.mxu0 %v3870_v63  ;;  %3293 = vmatpush3.msra.mxu1 %v1860_v16 }
 0xe2f   :  { %3285 = vmatprep.subr.mxu0 %v3568_v3  ;;  %3294 = vmatprep.subr.mxu1 %v3568_v3 }
 0xe30   :  { %3286 = vmatpush3.msra.mxu0 %v3877_v0  ;;  %3295 = vmatpush3.msra.mxu1 %v1859_v17 }
 0xe31   :  { %3301 = vmatprep.subr.mxu0 %v3568_v3  ;;  %3296 = vmatprep.subr.mxu1 %v3568_v3 }
 0xe32   :  { %3297 = vmatpush3.msra.mxu1 %v1858_v18 }
 0xe33   :  { %3312 = vmatprep.subr.mxu1 %v3568_v3 }
 0xe39   :  { %v1745_v33 = vpop.permute.xlu1 %1744 }
 0xe3a   :  { %3288 = vmatmul.mubr.msk.f32.vlgmr.msra.gmra.mxu0 %vm234_vm3, %v1745_v33 }
 0xe3b   :  { %3302 = vmatpush3.msra.mxu0 %v3824_v56  ;;  %3309 = vmatprep.mubr.msk.f32.mxu0 %vm3569_vm1, %v3568_v3 }
 0xe3c   :  { %3303 = vmatprep.subr.mxu0 %v3568_v3 }
 0xe3d   :  { %3304 = vmatpush3.msra.mxu0 %v3830_v58 }
 0xe3e   :  { %3305 = vmatprep.subr.mxu0 %v3568_v3 }
 0xe3f   :  { %3306 = vmatpush3.msra.mxu0 %v3839_v59 }
 0xe40   :  { %3307 = vmatprep.subr.mxu0 %v3568_v3 }
 0xe41   :  { %3308 = vmatpush3.msra.mxu0 %v3846_v60 }
 0xe42   :  { %3323 = vmatprep.subr.mxu0 %v3568_v3 }
 0xee9   :  { %v1627_v37 = vpop.f32.mrf.mxu0  ;;  %v1735_v56 = vpop.f32.mrf.mxu1 }
 0xeea   :  { %v1631_v38 = vadd.f32 %v1627_v37, %v1551_v34  ;;  %v1736_v58 = vadd.f32 %v3901_v15, %v1735_v56 }
 0xeeb   :  { %v3267_v35 = vpop.f32.mrf.mxu0  ;;  %v3278_v39 = vpop.f32.mrf.mxu1 }
 0xeec   :  { %v1632_v40 = vmul.f32 %v1631_v38, %v3807_v36 }
 0xeee   :  { %v2917_v2 = vmul.f32 -1.442695, %v1632_v40 }
 0xef0   :  { %3443 = vpow2.f32 %v2917_v2 }
 0xefa   :  { %v1814_v4 = vpop.f32.mrf.mxu0 }
 0xefb   :  { %v1818_v59 = vadd.f32 %v1814_v4, %v1736_v58 }
 0xefc   :  { %v3289_v5 = vpop.f32.mrf.mxu0 }
 0xefd   :  { %v3444_v8 = vpop.eup %3443  ;;  %v1819_v60 = vmul.f32 %v1818_v59, %v3807_v36 }
 0xefe   :  { %v1636_v43 = vadd.f32 1.0, %v3444_v8 }
 0xeff   :  { %v2922_v41 = vmul.f32 -1.442695, %v1819_v60 }
 0xf00   :  { %3445 = vrcp.f32 %v1636_v43 }
 0xf01   :  { %3447 = vpow2.f32 %v2922_v41 }
 0xf0d   :  { %v3446_v44 = vpop.eup %3445 }
 0xf0e   :  { %v3448_v46 = vpop.eup %3447  ;;  %v1639_v47 = vmul.f32 2.0, %v3446_v44  ;;  %v1641_v6 = vmul.f32 %v3446_v44, %v4078_v21 }
 0xf0f   :  { %v1823_v48 = vadd.f32 1.0, %v3448_v46 }
 0xf10   :  { %v2918_v49 = vadd.f32 -1.0, %v1639_v47 }
 0xf11   :  { %3449 = vrcp.f32 %v1823_v48 }
 0xf12   :  { %1643 = vrot.lane.b32.xlu0 %v2918_v49, %s3571_s6 }
 0xf1e   :  { %v3450_v50 = vpop.eup %3449 }
 0xf1f   :  { %v1826_v52 = vmul.f32 2.0, %v3450_v50  ;;  %v1828_v11 = vmul.f32 %v3450_v50, %v4083_v25 }
 0xf21   :  { %v2923_v53 = vadd.f32 -1.0, %v1826_v52 }
 0xf23   :  { %1830 = vrot.lane.b32.xlu1 %v2923_v53, %s3571_s6 }
 0xf84   :  { %v1644_v54 = vpop.permute.xlu0 %1643 }
 0xf85   :  { %v1646_v55 = vmul.f32 %v3446_v44, %v1644_v54  ;;  %v2272_v54 = vld [vmem:[%s4435_s7 + $0x18] sm:$0xff] }
 0xf87   :  { %1648 = vrot.lane.b32.xlu0 %v1646_v55, %s3572_s29  ;;  %v2271_v55 = vld [vmem:[%s4435_s7 + $0x10] sm:$0xff] }
 0xf95   :  { %v1831_v57 = vpop.permute.xlu1 %1830 }
 0xf96   :  { %v1833_v1 = vmul.f32 %v3450_v50, %v1831_v57  ;;  %v2270_v57 = vld [vmem:[%s4435_s7 + $0x8] sm:$0xff] }
 0xf98   :  { %1835 = vrot.lane.b32.xlu1 %v1833_v1, %s3572_s29 }
 0xff9   :  { %v1649_v7 = vpop.permute.xlu0 %1648 }
 0xffa   :  { %v4125_v9 = vadd.f32 %v1649_v7, %v1641_v6  ;;  %v2269_v6 = vld [vmem:[%s4435_s7] sm:$0xff] }
 0xffc   :  { %3451 = vtanh.f32 %v4125_v9 }
0x1009   :  { %v3452_v10 = vpop.eup %3451 }
0x100a   :  { %v1836_v12 = vpop.permute.xlu1 %1835  ;;  %1654 = vrot.lane.b32.xlu0 %v3452_v10, %s3571_s6 }
0x100b   :  { %v4130_v13 = vadd.f32 %v1836_v12, %v1828_v11  ;;  %v2353_v12 = vld [vmem:[%s4436_s8 + $0x18] sm:$0xff] }
0x100d   :  { %3453 = vtanh.f32 %v4130_v13 }
0x101a   :  { %v3454_v19 = vpop.eup %3453 }
0x101b   :  { %1841 = vrot.lane.b32.xlu1 %v3454_v19, %s3571_s6  ;;  %v2162_v19 = vld [vmem:[#allocation3 + $0xe] sm:$0x3] }
0x107c   :  { %v1655_v20 = vpop.permute.xlu0 %1654 }
0x107d   :  { %v1657_v21 = vmul.f32 %v3446_v44, %v1655_v20 }
0x107f   :  { %1863 = vrot.lane.b32.xlu0 %v1657_v21, %s3572_s29 }
0x108d   :  { %v1842_v22 = vpop.permute.xlu1 %1841 }
0x108e   :  { %v4151_v23 = vmul.f32 %v3450_v50, %v1842_v22 }
0x1090   :  { %2049 = vrot.lane.b32.xlu1 %v4151_v23, %s3572_s29 }
0x10f1   :  { %v1864_v24 = vpop.permute.xlu0 %1863 }
0x10f2   :  { %3299 = vmatmul.mubr.msk.f32.vlgmr.msra.gmra.mxu1 %vm234_vm3, %v1864_v24  ;;  %3310 = vmatmul.mubr.msk.f32.vlgmr.msra.gmra.mxu0 %vm234_vm3, %v1864_v24 }
0x10f3   :  { %3313 = vmatpush3.msra.mxu1 %v3853_v61  ;;  %3320 = vmatprep.mubr.msk.f32.mxu1 %vm3569_vm1, %v3568_v3 }
0x10f4   :  { %3314 = vmatprep.subr.mxu1 %v3568_v3  ;;  %3324 = vmatpush3.msra.mxu0 %v1861_v14  ;;  %v2352_v14 = vld [vmem:[%s4436_s8 + $0x10] sm:$0xff] }
0x10f5   :  { %3315 = vmatpush3.msra.mxu1 %v3861_v62  ;;  %3325 = vmatprep.subr.mxu0 %v3568_v3  ;;  %v1857_v62 = vld [vmem:[#allocation3 + $0xc] sm:$0x3] }
0x10f6   :  { %3316 = vmatprep.subr.mxu1 %v3568_v3  ;;  %3326 = vmatpush3.msra.mxu0 %v1860_v16  ;;  %v2351_v16 = vld [vmem:[%s4436_s8 + $0x8] sm:$0xff] }
0x10f7   :  { %3317 = vmatpush3.msra.mxu1 %v3870_v63  ;;  %3327 = vmatprep.subr.mxu0 %v3568_v3 }
0x10f8   :  { %3318 = vmatprep.subr.mxu1 %v3568_v3  ;;  %3328 = vmatpush3.msra.mxu0 %v1859_v17  ;;  %v2350_v17 = vld [vmem:[%s4436_s8] sm:$0xff] }
0x10f9   :  { %3319 = vmatpush3.msra.mxu1 %v3877_v0  ;;  %3329 = vmatprep.subr.mxu0 %v3568_v3 }
0x10fa   :  { %3334 = vmatprep.subr.mxu1 %v3568_v3  ;;  %3330 = vmatpush3.msra.mxu0 %v1858_v18 }
0x10fb   :  { %3331 = vmatprep.mubr.msk.f32.mxu0 %vm3569_vm1, %v3568_v3  ;;  %3345 = vmatprep.subr.mxu0 %v3568_v3 }
0x1102   :  { %v2050_v61 = vpop.permute.xlu1 %2049 }
0x1103   :  { %3321 = vmatmul.mubr.msk.f32.vlgmr.msra.gmra.mxu1 %vm234_vm3, %v2050_v61 }
0x1104   :  { %3342 = vmatprep.mubr.msk.f32.mxu1 %vm3569_vm1, %v3568_v3  ;;  %3335 = vmatpush3.msra.mxu1 %v2272_v54 }
0x1105   :  { %3336 = vmatprep.subr.mxu1 %v3568_v3 }
0x1106   :  { %3337 = vmatpush3.msra.mxu1 %v2271_v55 }
0x1107   :  { %3338 = vmatprep.subr.mxu1 %v3568_v3 }
0x1108   :  { %3339 = vmatpush3.msra.mxu1 %v2270_v57 }
0x1109   :  { %3340 = vmatprep.subr.mxu1 %v3568_v3 }
0x110a   :  { %3341 = vmatpush3.msra.mxu1 %v2269_v6 }
0x110b   :  { %3356 = vmatprep.subr.mxu1 %v3568_v3 }
0x11b2   :  { %v1933_v63 = vpop.f32.mrf.mxu1  ;;  %v2041_v25 = vpop.f32.mrf.mxu0 }
0x11b3   :  { %v1937_v0 = vadd.f32 %v1933_v63, %v1857_v62  ;;  %v2042_v32 = vadd.f32 %v3901_v15, %v2041_v25  ;;  %v2935_v25 = vld [vmem:[%s4437_s9] ss:$0 sm:$0xff] }
0x11b4   :  { %v3300_v26 = vpop.f32.mrf.mxu1  ;;  %v3311_v28 = vpop.f32.mrf.mxu0 }
0x11b5   :  { %v1938_v29 = vmul.f32 %v1937_v0, %v3807_v36 }
0x11b7   :  { %v2925_v30 = vmul.f32 -1.442695, %v1938_v29 }
0x11b9   :  { %3455 = vpow2.f32 %v2925_v30 }
0x11c3   :  { %v2119_v33 = vpop.f32.mrf.mxu1 }
0x11c4   :  { %v2123_v34 = vadd.f32 %v2119_v33, %v2042_v32 }
0x11c5   :  { %v3322_v37 = vpop.f32.mrf.mxu1 }
0x11c6   :  { %v3456_v56 = vpop.eup %3455  ;;  %v2124_v38 = vmul.f32 %v2123_v34, %v3807_v36 }
0x11c7   :  { %v1942_v35 = vadd.f32 1.0, %v3456_v56 }
0x11c8   :  { %v2930_v39 = vmul.f32 -1.442695, %v2124_v38 }
0x11c9   :  { %3457 = vrcp.f32 %v1942_v35 }
0x11ca   :  { %3459 = vpow2.f32 %v2930_v39 }
0x11d6   :  { %v3458_v40 = vpop.eup %3457 }
0x11d7   :  { %v3460_v2 = vpop.eup %3459  ;;  %v1945_v58 = vmul.f32 2.0, %v3458_v40  ;;  %v1947_v46 = vmul.f32 %v3458_v40, %v4125_v9 }
0x11d8   :  { %v2128_v4 = vadd.f32 1.0, %v3460_v2 }
0x11d9   :  { %v2926_v59 = vadd.f32 -1.0, %v1945_v58 }
0x11da   :  { %3461 = vrcp.f32 %v2128_v4 }
0x11db   :  { %1949 = vrot.lane.b32.xlu0 %v2926_v59, %s3571_s6 }
0x11e7   :  { %v3462_v5 = vpop.eup %3461 }
0x11e8   :  { %v2131_v15 = vmul.f32 2.0, %v3462_v5  ;;  %v2133_v50 = vmul.f32 %v3462_v5, %v4130_v13 }
0x11ea   :  { %v2931_v8 = vadd.f32 -1.0, %v2131_v15 }
0x11ec   :  { %2135 = vrot.lane.b32.xlu1 %v2931_v8, %s3571_s6 }
0x124d   :  { %v1950_v60 = vpop.permute.xlu0 %1949 }
0x124e   :  { %v1952_v43 = vmul.f32 %v3458_v40, %v1950_v60 }
0x1250   :  { %1954 = vrot.lane.b32.xlu0 %v1952_v43, %s3572_s29 }
0x125e   :  { %v2136_v41 = vpop.permute.xlu1 %2135 }
0x125f   :  { %v2138_v44 = vmul.f32 %v3462_v5, %v2136_v41 }
0x1261   :  { %2140 = vrot.lane.b32.xlu1 %v2138_v44, %s3572_s29 }
0x12c2   :  { %v1955_v47 = vpop.permute.xlu0 %1954 }
0x12c3   :  { %v4184_v48 = vadd.f32 %v1955_v47, %v1947_v46 }
0x12c5   :  { %3463 = vtanh.f32 %v4184_v48 }
0x12d2   :  { %v3464_v49 = vpop.eup %3463 }
0x12d3   :  { %v2141_v52 = vpop.permute.xlu1 %2140  ;;  %1960 = vrot.lane.b32.xlu0 %v3464_v49, %s3571_s6 }
0x12d4   :  { %v4189_v53 = vadd.f32 %v2141_v52, %v2133_v50 }
0x12d6   :  { %3465 = vtanh.f32 %v4189_v53 }
0x12e3   :  { %v3466_v1 = vpop.eup %3465 }
0x12e4   :  { %2146 = vrot.lane.b32.xlu1 %v3466_v1, %s3571_s6 }
0x1345   :  { %v1961_v7 = vpop.permute.xlu0 %1960 }
0x1346   :  { %v1963_v9 = vmul.f32 %v3458_v40, %v1961_v7 }
0x1348   :  { %2168 = vrot.lane.b32.xlu0 %v1963_v9, %s3572_s29 }
0x1356   :  { %v2147_v10 = vpop.permute.xlu1 %2146 }
0x1357   :  { %v4210_v11 = vmul.f32 %v3462_v5, %v2147_v10 }
0x1359   :  { %2354 = vrot.lane.b32.xlu1 %v4210_v11, %s3572_s29 }
0x13ba   :  { %v2169_v13 = vpop.permute.xlu0 %2168 }
0x13bb   :  { %3332 = vmatmul.mubr.msk.f32.vlgmr.msra.gmra.mxu0 %vm234_vm3, %v2169_v13  ;;  %3343 = vmatmul.mubr.msk.f32.vlgmr.msra.gmra.mxu1 %vm234_vm3, %v2169_v13 }
0x13bc   :  { %3346 = vmatpush3.msra.mxu0 %v2353_v12  ;;  %3353 = vmatprep.mubr.msk.f32.mxu0 %vm3569_vm1, %v3568_v3 }
0x13bd   :  { %3347 = vmatprep.subr.mxu0 %v3568_v3  ;;  %3357 = vmatpush3.msra.mxu1 %v2272_v54 }
0x13be   :  { %3348 = vmatpush3.msra.mxu0 %v2352_v14  ;;  %3358 = vmatprep.subr.mxu1 %v3568_v3 }
0x13bf   :  { %3349 = vmatprep.subr.mxu0 %v3568_v3  ;;  %3359 = vmatpush3.msra.mxu1 %v2271_v55 }
0x13c0   :  { %3350 = vmatpush3.msra.mxu0 %v2351_v16  ;;  %3360 = vmatprep.subr.mxu1 %v3568_v3 }
0x13c1   :  { %3351 = vmatprep.subr.mxu0 %v3568_v3  ;;  %3361 = vmatpush3.msra.mxu1 %v2270_v57 }
0x13c2   :  { %3352 = vmatpush3.msra.mxu0 %v2350_v17  ;;  %3362 = vmatprep.subr.mxu1 %v3568_v3 }
0x13c3   :  { %3363 = vmatpush3.msra.mxu1 %v2269_v6  ;;  %3364 = vmatprep.mubr.msk.f32.mxu1 %vm3569_vm1, %v3568_v3 }
0x13c4   :  { %3367 = vmatprep.subr.mxu0 %v3568_v3 }
0x13cb   :  { %v2355_v18 = vpop.permute.xlu1 %2354 }
0x13cc   :  { %3354 = vmatmul.mubr.msk.f32.vlgmr.msra.gmra.mxu0 %vm234_vm3, %v2355_v18 }
0x13cd   :  { %3368 = vmatpush3.msra.mxu0 %v2353_v12  ;;  %3375 = vmatprep.mubr.msk.f32.mxu0 %vm3569_vm1, %v3568_v3 }
0x13ce   :  { %3369 = vmatprep.subr.mxu0 %v3568_v3 }
0x13cf   :  { %3370 = vmatpush3.msra.mxu0 %v2352_v14 }
0x13d0   :  { %3371 = vmatprep.subr.mxu0 %v3568_v3 }
0x13d1   :  { %3372 = vmatpush3.msra.mxu0 %v2351_v16  ;;  %v3573_v16 = vmov 1983009808  }
0x13d2   :  { %3373 = vmatprep.subr.mxu0 %v3568_v3 }
0x13d3   :  { %3374 = vmatpush3.msra.mxu0 %v2350_v17  ;;  %v633_v17 = vunpack.c.l.s4 %v3573_v16 }
0x13d5   :  { %v634_v18 = vunpack.c.0.s8 %v633_v17 }
0x147b   :  { %v2238_v20 = vpop.f32.mrf.mxu0  ;;  %v2346_v21 = vpop.f32.mrf.mxu1 }
0x147c   :  { %v2242_v22 = vadd.f32 %v2238_v20, %v2162_v19  ;;  %v2347_v0 = vadd.f32 %v2935_v25, %v2346_v21  ;;  %v636_v19 = vshrl.u32 %v219_v27, 7 }
0x147d   :  { %v3333_v24 = vpop.f32.mrf.mxu0  ;;  %v3344_v61 = vpop.f32.mrf.mxu1 }
0x147e   :  { %v2243_v62 = vmul.f32 %v2242_v22, %v3807_v36  ;;  %v4277_v22 = vsub.s32 %v634_v18, %v636_v19 }
0x1480   :  { %v2933_v63 = vmul.f32 -1.442695, %v2243_v62  ;;  %v944_v61 = vrot.slane %v3978_v45, %v4277_v22  ;;  %v2157_v45 = vrot.slane %v4210_v11, %v4277_v22  ;;  %v2706_v11 = vld [vmem:[%s4438_s10 + $0xe8] sm:$0xff] }
0x1482   :  { %3467 = vpow2.f32 %v2933_v63 }
0x148c   :  { %v2424_v26 = vpop.f32.mrf.mxu0 }
0x148d   :  { %v2428_v28 = vadd.f32 %v2424_v26, %v2347_v0  ;;  %v1250_v0 = vrot.slane %v4033_v42, %v4277_v22  ;;  %v2692_v26 = vld [vmem:[%s4438_s10 + $0x78] sm:$0xff]  ;;  %v2691_v42 = vld [vmem:[%s4438_s10 + $0x70] sm:$0xff] }
0x148e   :  { %v3355_v29 = vpop.f32.mrf.mxu0 }
0x148f   :  { %v3468_v3 = vpop.eup %3467  ;;  %v2429_v30 = vmul.f32 %v2428_v28, %v3807_v36  ;;  %v2707_v28 = vld [vmem:[%s4438_s10 + $0xf0] sm:$0xff]  ;;  %v2690_v29 = vld [vmem:[%s4438_s10 + $0x68] sm:$0xff] }
0x1490   :  { %v2247_v32 = vadd.f32 1.0, %v3468_v3  ;;  %v2705_v3 = vld [vmem:[%s4438_s10 + $0xe0] sm:$0xff] }
0x1491   :  { %v2938_v33 = vmul.f32 -1.442695, %v2429_v30  ;;  %v2689_v30 = vld [vmem:[%s4438_s10 + $0x60] sm:$0xff] }
0x1492   :  { %3469 = vrcp.f32 %v2247_v32  ;;  %v2704_v32 = vld [vmem:[%s4438_s10 + $0xd8] sm:$0xff] }
0x1493   :  { %3471 = vpow2.f32 %v2938_v33  ;;  %v2688_v33 = vld [vmem:[%s4438_s10 + $0x58] sm:$0xff] }
0x149f   :  { %v3470_v34 = vpop.eup %3469 }
0x14a0   :  { %v3472_v37 = vpop.eup %3471  ;;  %v2250_v56 = vmul.f32 2.0, %v3470_v34  ;;  %v2252_v15 = vmul.f32 %v3470_v34, %v4184_v48 }
0x14a1   :  { %v2433_v38 = vadd.f32 1.0, %v3472_v37  ;;  %v2687_v37 = vld [vmem:[%s4438_s10 + $0x50] sm:$0xff] }
0x14a2   :  { %v2934_v35 = vadd.f32 -1.0, %v2250_v56  ;;  %v2702_v56 = vld [vmem:[%s4438_s10 + $0xc8] sm:$0xff] }
0x14a3   :  { %3473 = vrcp.f32 %v2433_v38  ;;  %v2686_v38 = vld [vmem:[%s4438_s10 + $0x48] sm:$0xff] }
0x14a4   :  { %2254 = vrot.lane.b32.xlu0 %v2934_v35, %s3571_s6  ;;  %v2701_v35 = vld [vmem:[%s4438_s10 + $0xc0] sm:$0xff] }
0x14b0   :  { %v3474_v39 = vpop.eup %3473 }
0x14b1   :  { %v2436_v40 = vmul.f32 2.0, %v3474_v39  ;;  %v2438_v41 = vmul.f32 %v3474_v39, %v4189_v53 }
0x14b3   :  { %v2939_v2 = vadd.f32 -1.0, %v2436_v40 }
0x14b5   :  { %2440 = vrot.lane.b32.xlu1 %v2939_v2, %s3571_s6 }
0x1516   :  { %v2255_v58 = vpop.permute.xlu0 %2254 }
0x1517   :  { %v2257_v4 = vmul.f32 %v3470_v34, %v2255_v58 }
0x1519   :  { %2259 = vrot.lane.b32.xlu0 %v2257_v4, %s3572_s29  ;;  %v2700_v4 = vld [vmem:[%s4438_s10 + $0xb8] sm:$0xff] }
0x1527   :  { %v2441_v59 = vpop.permute.xlu1 %2440 }
0x1528   :  { %v2443_v5 = vmul.f32 %v3474_v39, %v2441_v59 }
0x152a   :  { %2445 = vrot.lane.b32.xlu1 %v2443_v5, %s3572_s29  ;;  %v2684_v5 = vld [vmem:[%s4438_s10 + $0x38] sm:$0xff] }
0x158b   :  { %v2260_v8 = vpop.permute.xlu0 %2259 }
0x158c   :  { %v4255_v60 = vadd.f32 %v2260_v8, %v2252_v15  ;;  %v2699_v15 = vld [vmem:[%s4438_s10 + $0xb0] sm:$0xff] }
0x158d   :  { %v2683_v8 = vld [vmem:[%s4438_s10 + $0x30] sm:$0xff] }
0x158e   :  { %3475 = vtanh.f32 %v4255_v60 }
0x159b   :  { %v3476_v43 = vpop.eup %3475 }
0x159c   :  { %v2446_v44 = vpop.permute.xlu1 %2445  ;;  %2265 = vrot.lane.b32.xlu0 %v3476_v43, %s3571_s6  ;;  %v2698_v43 = vld [vmem:[%s4438_s10 + $0xa8] sm:$0xff] }
0x159d   :  { %v4260_v46 = vadd.f32 %v2446_v44, %v2438_v41  ;;  %v2682_v44 = vld [vmem:[%s4438_s10 + $0x28] sm:$0xff] }
0x159f   :  { %3477 = vtanh.f32 %v4260_v46 }
0x15ac   :  { %v3478_v47 = vpop.eup %3477 }
0x15ad   :  { %2451 = vrot.lane.b32.xlu1 %v3478_v47, %s3571_s6  ;;  %v2681_v47 = vld [vmem:[%s4438_s10 + $0x20] sm:$0xff] }
0x160e   :  { %v2266_v49 = vpop.permute.xlu0 %2265 }
0x160f   :  { %v2268_v48 = vmul.f32 %v3470_v34, %v2266_v49  ;;  %v2703_v34 = vld [vmem:[%s4438_s10 + $0xd0] sm:$0xff]  ;;  %v2696_v49 = vld [vmem:[%s4438_s10 + $0x98] sm:$0xff] }
0x1611   :  { %2479 = vrot.lane.b32.xlu0 %v2268_v48, %s3572_s29 }
0x161f   :  { %v2452_v50 = vpop.permute.xlu1 %2451 }
0x1620   :  { %v4265_v52 = vmul.f32 %v3474_v39, %v2452_v50  ;;  %v2685_v39 = vld [vmem:[%s4438_s10 + $0x40] sm:$0xff]  ;;  %v2680_v50 = vld [vmem:[%s4438_s10 + $0x18] sm:$0xff] }
0x1622   :  { %2557 = vrot.lane.b32.xlu1 %v4265_v52, %s3572_s29 }
0x1683   :  { %v2480_v53 = vpop.permute.xlu0 %2479 }
0x1684   :  { %3365 = vmatmul.mubr.msk.f32.vlgmr.msra.gmra.mxu1 %vm234_vm3, %v2480_v53  ;;  %2660 = vst.msk [vmem:[#allocation9] sm:$0x3] %vm642_vm7, %v2480_v53  ;;  %v2695_v53 = vld [vmem:[%s4438_s10 + $0x90] sm:$0xff] }
0x1694   :  { %v2558_v54 = vpop.permute.xlu1 %2557 }
0x1695   :  { %3376 = vmatmul.mubr.msk.f32.vlgmr.msra.gmra.mxu0 %vm234_vm3, %v2558_v54  ;;  %v2679_v54 = vld [vmem:[%s4438_s10 + $0x10] sm:$0xff] }
0x1744   :  { %v2549_v55 = vpop.f32.mrf.mxu1 }
0x1745   :  { %v2550_v1 = vadd.f32 %v2935_v25, %v2549_v55  ;;  %v1852_v25 = vrot.slane %v4151_v23, %v4277_v22  ;;  %v2708_v23 = vld [vmem:[%s4438_s10 + $0xf8] sm:$0xff]  ;;  %v2694_v55 = vld [vmem:[%s4438_s10 + $0x88] sm:$0xff] }
0x1746   :  { %v3366_v57 = vpop.f32.mrf.mxu1  ;;  %3072 = vmatprep.subr.mxu1 %v2708_v23 }
0x1747   :  { %3073 = vmatpush3.msra.mxu1 %v2692_v26  ;;  %v2678_v57 = vld [vmem:[%s4438_s10 + $0x8] sm:$0xff] }
0x1748   :  { %3074 = vmatprep.subr.mxu1 %v2707_v28 }
0x1749   :  { %3075 = vmatpush3.msra.mxu1 %v2691_v42 }
0x174a   :  { %3076 = vmatprep.subr.mxu1 %v2706_v11 }
0x174b   :  { %3077 = vmatpush3.msra.mxu1 %v2690_v29 }
0x174c   :  { %3078 = vmatprep.subr.mxu1 %v2705_v3 }
0x174d   :  { %3079 = vmatpush3.msra.mxu1 %v2689_v30 }
0x174e   :  { %3080 = vmatprep.subr.mxu1 %v2704_v32 }
0x174f   :  { %3081 = vmatpush3.msra.mxu1 %v2688_v33 }
0x1750   :  { %3082 = vmatprep.subr.mxu1 %v2703_v34 }
0x1751   :  { %3083 = vmatpush3.msra.mxu1 %v2687_v37 }
0x1752   :  { %3084 = vmatprep.subr.mxu1 %v2702_v56 }
0x1753   :  { %3085 = vmatpush3.msra.mxu1 %v2686_v38 }
0x1754   :  { %3086 = vmatprep.subr.mxu1 %v2701_v35 }
0x1755   :  { %v2627_v6 = vpop.f32.mrf.mxu0  ;;  %3087 = vmatpush3.msra.mxu1 %v2685_v39 }
0x1756   :  { %v2631_v7 = vadd.f32 %v2627_v6, %v2550_v1  ;;  %3088 = vmatprep.subr.mxu1 %v2700_v4  ;;  %v2693_v1 = vld [vmem:[%s4438_s10 + $0x80] sm:$0xff] }
0x1757   :  { %v3377_v9 = vpop.f32.mrf.mxu0  ;;  %3089 = vmatpush3.msra.mxu1 %v2684_v5 }
0x1758   :  { %v2632_v10 = vmul.f32 %v2631_v7, %v3807_v36  ;;  %v638_v36 = vrot.slane %v3923_v51, %v4277_v22  ;;  %3090 = vmatprep.subr.mxu1 %v2699_v15  ;;  %v2677_v7 = vld [vmem:[%s4438_s10] sm:$0xff] }
0x1759   :  { %3091 = vmatpush3.msra.mxu1 %v2683_v8 }
0x175a   :  { %v2943_v12 = vmul.f32 -1.442695, %v2632_v10  ;;  %3092 = vmatprep.subr.mxu1 %v2698_v43 }
0x175b   :  { %3093 = vmatpush3.msra.mxu1 %v2682_v44 }
0x175c   :  { %3479 = vpow2.f32 %v2943_v12 }
0x1769   :  { %v3480_v13 = vpop.eup %3479 }
0x176a   :  { %v2636_v14 = vadd.f32 1.0, %v3480_v13 }
0x176c   :  { %3481 = vrcp.f32 %v2636_v14 }
0x1779   :  { %v4274_v20 = vpop.eup %3481 }
0x177a   :  { %v2639_v21 = vmul.f32 2.0, %v4274_v20  ;;  %v2641_v40 = vmul.f32 %v4274_v20, %v4260_v46  ;;  %v2697_v46 = vld [vmem:[%s4438_s10 + $0xa0] sm:$0xff]  ;;  %s3575_s10 = smov [#allocation9]  }
0x177b   :  { %3094 = vmatprep.subr.mxu1 %v2697_v46 }
0x177c   :  { %v2944_v24 = vadd.f32 -1.0, %v2639_v21  ;;  %3095 = vmatpush3.msra.mxu1 %v2681_v47 }
0x177d   :  { %3096 = vmatprep.subr.mxu1 %v2696_v49 }
0x177e   :  { %2643 = vrot.lane.b32.xlu0 %v2944_v24, %s3571_s6  ;;  %3097 = vmatpush3.msra.mxu1 %v2680_v50 }
0x177f   :  { %3098 = vmatprep.subr.mxu1 %v2695_v53 }
0x1780   :  { %3099 = vmatpush3.msra.mxu1 %v2679_v54 }
0x1781   :  { %3100 = vmatprep.subr.mxu1 %v2694_v55 }
0x1782   :  { %639 = vrot.lane.b32.xlu0 %v638_v36, %s3572_s29  ;;  %3101 = vmatpush3.msra.mxu1 %v2678_v57 }
0x1783   :  { %3102 = vmatprep.subr.mxu1 %v2693_v1 }
0x1784   :  { %3103 = vmatpush3.msra.mxu1 %v2677_v7 }
0x1786   :  { %945 = vrot.lane.b32.xlu0 %v944_v61, %s3571_s6 }
0x17f0   :  { %v2644_v27 = vpop.permute.xlu0 %2643 }
0x17f1   :  { %v2646_v62 = vmul.f32 %v4274_v20, %v2644_v27 }
0x17f3   :  { %2648 = vrot.lane.b32.xlu1 %v2646_v62, %s3572_s29 }
0x17f4   :  { %v640_v63 = vpop.permute.xlu0 %639 }
0x17f5   :  { %643 = vst.msk [vmem:[#allocation4] sm:$0x3] %vm642_vm7, %v640_v63 }
0x17f7   :  { %1853 = vrot.lane.b32.xlu1 %v1852_v25, %s3572_s29 }
0x17f8   :  { %v946_v51 = vpop.permute.xlu0 %945 }
0x17f9   :  { %949 = vst.msk [vmem:[#allocation4] sm:$0x3] %vm948_vm8, %v946_v51 }
0x17fb   :  { %2158 = vrot.lane.b32.xlu1 %v2157_v45, %s3571_s6 }
0x17ff   :  { %1251 = vrot.lane.b32.xlu1 %v1250_v0, %s3574_s5 }
0x1865   :  { %v2649_v2 = vpop.permute.xlu1 %2648 }
0x1866   :  { %v2651_v58 = vadd.f32 %v2649_v2, %v2641_v40 }
0x1868   :  { %3483 = vtanh.f32 %v2651_v58 }
0x1869   :  { %v1854_v59 = vpop.permute.xlu1 %1853 }
0x186a   :  { %1856 = vst.msk [vmem:[#allocation4 + $0x2] sm:$0x3] %vm642_vm7, %v1854_v59 }
0x186d   :  { %v2159_v41 = vpop.permute.xlu1 %2158 }
0x186e   :  { %2161 = vst.msk [vmem:[#allocation4 + $0x2] sm:$0x3] %vm948_vm8, %v2159_v41 }
0x1871   :  { %v1252_v48 = vpop.permute.xlu1 %1251 }
0x1872   :  { %1255 = vst.msk [vmem:[#allocation4] sm:$0x3] %vm1254_vm9, %v1252_v48 }
0x1873   :  { %1550 = vst.msk [vmem:[#allocation4] sm:$0x3] %vm1549_vm10, %v4088_v31  ;;  %v2462_v31 = vrot.slane %v4265_v52, %v4277_v22 }
0x1875   :  { %v3484_v6 = vpop.eup %3483 }
0x1876   :  { %2654 = vrot.lane.b32.xlu0 %v3484_v6, %s3571_s6  ;;  %s2821_s6 = sshll.u32 %s3575_s10, 4  ;;  %s2822_s6 = int_to_ptr.vmem [resolvable:$true] %s2821_s6 }
0x1877   :  { %p3506_p6 = scmp.lt.s32.totalorder %s2822_s6, %s2822_s6 }
0x187a   :  { %2463 = vrot.lane.b32.xlu0 %v2462_v31, %s3574_s5 }
0x187e   :  { %2662 = vrot.lane.b32.xlu0 %v4255_v60, %s3574_s5 }
0x18e8   :  { %v2655_v9 = vpop.permute.xlu0 %2654 }
0x18e9   :  { %v2657_v10 = vmul.f32 %v4274_v20, %v2655_v9 }
0x18eb   :  { %2667 = vrot.lane.b32.xlu1 %v2657_v10, %s3572_s29  ;;  %s3501_s29 = scalar_lea.vmem %s2822_s6, 64 }
0x18ec   :  { %v2464_v12 = vpop.permute.xlu0 %2463  ;;  %p3502_p5 = scmp.ne.s32.totalorder %s2822_s6, %s3501_s29  ;;  %p3507_p7 = scmp.lt.s32.totalorder %s3501_s29, %s3501_s29 }
0x18ed   :  { %2466 = vst.msk [vmem:[#allocation4 + $0x2] sm:$0x3] %vm1254_vm9, %v2464_v12 }
0x18ee   :  { %2658 = vst.msk [vmem:[#allocation4 + $0x2] sm:$0x3] %vm1549_vm10, %v2657_v10  ;;  %p3508_p8 = por %p3507_p7, %p3506_p6 }
0x18ef   :  { %2672 = vrot.lane.b32.xlu1 %v2651_v58, %s3574_s5 }
0x18f0   :  { %v2663_v13 = vpop.permute.xlu0 %2662  ;;  %p3509_p9 = pnand %p3508_p8, %p3502_p5 }
0x18f1   :  { %2665 = vst.msk [vmem:[#allocation11] sm:$0x3] %vm642_vm7, %v2663_v13 }
0x18f5   :  { %v2946_v52 = vld.sshfl [vmem:[#allocation4] sm:$0x33 pattern:$0x76325410] }
0x18f6   :  { %v2724_v14 = vcombine.high %v2946_v52, %v2946_v52 }
0x18f8   :  { %2791 = vmatprep.mubr.f32.mxu1 %v2724_v14 }
0x18f9   :  { %2792 = vmatmul.mubr.f32.vlgmr.msra.gmra.mxu1 %v2946_v52 }
0x195d   :  { %v2668_v60 = vpop.permute.xlu1 %2667 }
0x195e   :  { %2670 = vst.msk [vmem:[#allocation9 + $0x2] sm:$0x3] %vm642_vm7, %v2668_v60 }
0x195f   :  { %3512 = shalt.err (!%p3509_p9)
}
0x1960   :  { %2824 = dma.vmem_to_hbm [thread:$0]  %s2822_s6, 64, %s4441_s13, [#allocation10]  }
0x1961   :  { %s3576_s3 = smov [#allocation11]   ;;  %v2673_v16 = vpop.permute.xlu1 %2672 }
0x1962   :  { %s2831_s17 = sshll.u32 %s3576_s3, 4  ;;  %2675 = vst.msk [vmem:[#allocation11 + $0x2] sm:$0x3] %vm642_vm7, %v2673_v16  ;;  %s2832_s17 = int_to_ptr.vmem [resolvable:$true] %s2831_s17 }
0x1963   :  { %s3521_s8 = scalar_lea.vmem %s2832_s17, 64  ;;  %p3526_p11 = scmp.lt.s32.totalorder %s2832_s17, %s2832_s17 }
0x1964   :  { %p3522_p10 = scmp.ne.s32.totalorder %s2832_s17, %s3521_s8  ;;  %p3527_p12 = scmp.lt.s32.totalorder %s3521_s8, %s3521_s8 }
0x1966   :  { %p3528_p13 = por %p3527_p12, %p3526_p11 }
0x1968   :  { %p3529_p0 = pnand %p3528_p13, %p3522_p10 }
0x196a   :  { %3532 = shalt.err (!%p3529_p0)
}
0x196b   :  { %2834 = dma.vmem_to_hbm [thread:$0]  %s2832_s17, 64, %s4442_s14, [#allocation10]   ;;  %v2945_v18 = vld [vmem:[%s4439_s11] ss:$0 sm:$0xff]  ;;  %vm2803_vm11 = vcmask 25600  }
0x196c   :  { %s3577_s22 = smov [#allocation8]  }
0x196d   :  { %s2811_s15 = sshll.u32 %s3577_s22, 4  ;;  %s2812_s15 = int_to_ptr.vmem [resolvable:$true] %s2811_s15 }
0x196e   :  { %s3541_s14 = scalar_lea.vmem %s2812_s15, 32  ;;  %p3546_p2 = scmp.lt.s32.totalorder %s2812_s15, %s2812_s15 }
0x196f   :  { %p3542_p1 = scmp.ne.s32.totalorder %s2812_s15, %s3541_s14  ;;  %p3547_p3 = scmp.lt.s32.totalorder %s3541_s14, %s3541_s14 }
0x1971   :  { %p3548_p4 = por %p3547_p3, %p3546_p2 }
0x1973   :  { %p3549_p5 = pnand %p3548_p4, %p3542_p1 }
0x19b9   :  { %v3104_v17 = vpop.f32.mrf.mxu1 }
0x19bb   :  { %v3105_v19 = vpop.f32.mrf.mxu1 }
0x19bc   :  { %v3106_v20 = vadd.f32 %v3105_v19, %v3104_v17 }
0x19be   :  { %v2794_v21 = vadd.f32 %v3106_v20, %v2945_v18 }
0x19c0   :  { %v2947_v22 = vmul.f32 -1.442695, %v2794_v21 }
0x19c2   :  { %3485 = vpow2.f32 %v2947_v22 }
0x19cf   :  { %v3486_v24 = vpop.eup %3485 }
0x19d0   :  { %v2800_v36 = vadd.f32 1.0, %v3486_v24 }
0x19d2   :  { %3487 = vrcp.f32 %v2800_v36 }
0x19df   :  { %v3488_v61 = vpop.eup %3487 }
0x19e0   :  { %2804 = vst.msk [vmem:[#allocation8] sm:$0x3] %vm2803_vm11, %v3488_v61 }
0x19e1   :  { %3552 = shalt.err (!%p3549_p5)
}
0x19e2   :  { %2814 = dma.vmem_to_hbm [thread:$0]  %s2812_s15, 32, %s4440_s12, [#allocation6]  }
0x19e3   :  { %3563 = dma.done.wait [#allocation6], 32  }
0x19e4   :  { %3564 = vsyncadd [#allocation6], 4294967264 }
0x19e5   :  { %3565 = dma.done.wait [#allocation10], 128  }
0x19e6   :  { %3566 = vsyncadd [#allocation10], 4294967168 }
0x19e7   :  { %2844 = vsyncpa [#allocation6], 1 }
0x19e8   :  { %2845 = vsyncpa [#allocation10], 1 }
0x19e9   :  { %2846 = vsyncpa [#allocation7], 1 }

</bundles_post_ra>
